<compile_context>
chip_gen: v7x
topology: tpu7x:2x2x1
jax: 0.10.0
libtpu: 0.0.40
codegen_flags: <defaults>
</compile_context>

<pallas_src>
import functools

import jax
import jax.numpy as jnp
from jax.experimental import pallas as pl
from jax.experimental.pallas import tpu as pltpu


_LANE = 128  # lane width: batch tiles are multiples of this so every block is lane-dense


def _round_up(x, m):
    return (x + m - 1) // m * m


def _cdiv(a, b):
    return (a + b - 1) // b


def _critic_kernel(x_ref, w1_ref, b1_ref, w2_ref, b2_ref, w3_ref, b3_ref, o_ref):
    """Fused 3-layer MLP over one (·, tb) batch lane-block, feature-major.

    x_ref : (S+A, tb)  bf16/f32 activations (batch on lanes)
    w1_ref: (512, S+A) bf16/f32   b1_ref: (512, 1) f32
    w2_ref: (256, 512) bf16/f32   b2_ref: (256, 1) f32
    w3_ref: (256, 1)   f32        b3_ref: (1, 1)   f32
    o_ref : (1, tb)    f32 lane-dense output row
    """
    # Layer 1 — single K = S+A MXU matmul (concat fused in the wrapper).
    h1 = jnp.dot(w1_ref[...], x_ref[...], preferred_element_type=jnp.float32)
    h1 = jnp.maximum(h1 + b1_ref[...], 0.0)                       # (512, tb) f32

    # Layer 2 — MXU matmul, f32 accumulation.
    h2 = jnp.dot(w2_ref[...], h1.astype(w2_ref.dtype),
                 preferred_element_type=jnp.float32)
    h2 = jnp.maximum(h2 + b2_ref[...], 0.0)                       # (256, tb) f32

    # Layer 3 (256 -> 1) — VPU multiply + sublane (XLU) reduction; result is
    # already a lane-dense (1, tb) row, no relayout needed.
    out = jnp.sum(h2 * w3_ref[...], axis=0, keepdims=True) + b3_ref[...]
    o_ref[...] = out.astype(o_ref.dtype)


def _pick_batch_tile(B, block_rows):
    """Choose (tb, Bp, n_blocks). tb is always a multiple of 128 (lane width).

    Prefers >= 2 blocks and an even block count when the batch is large enough,
    so v7x's two TensorCores both get work under the 'parallel' grid axis."""
    block_rows = max(_LANE, _round_up(block_rows, _LANE))
    Bp0 = _round_up(B, _LANE)
    if Bp0 <= _LANE:
        tb = Bp0
    else:
        tb = min(block_rows, _round_up(_cdiv(Bp0, 2), _LANE))
    Bp = _round_up(B, tb)
    n = Bp // tb
    if n > 1 and n % 2 == 1:
        tb2 = max(_LANE, _round_up(_cdiv(B, n + 1), _LANE))
        Bp2 = _round_up(B, tb2)
        n2 = Bp2 // tb2
        if n2 % 2 == 0:
            tb, Bp, n = tb2, Bp2, n2
    return tb, Bp, n


def prepare_ap_critic_params(params, use_bf16=True):
    """One-time weight prep (call once, reuse across forward calls).

    params are in PyTorch nn.Linear layout: w (out_features, in_features), b (out,).
    Matmul weights are cast to bf16; biases and the 256->1 head stay f32."""
    w1, b1, w2, b2, w3, b3 = params
    mm = jnp.bfloat16 if use_bf16 else jnp.float32
    return (
        w1.astype(mm),                               # (512, S+A)
        b1.reshape(-1, 1).astype(jnp.float32),       # (512, 1)
        w2.astype(mm),                               # (256, 512)
        b2.reshape(-1, 1).astype(jnp.float32),       # (256, 1)
        w3.reshape(-1, 1).astype(jnp.float32),       # (256, 1)  head weight column (f32 VPU path)
        b3.reshape(1, 1).astype(jnp.float32),        # (1, 1)
    )


@functools.partial(jax.jit, static_argnames=("block_rows",))
def ap_critic_forward(global_state, all_actions, prepared_params, block_rows=1024):
    """Pallas implementation of APCritic.forward.

    global_state: (B, S) f32
    all_actions:  (B, A) f32
    prepared_params: output of prepare_ap_critic_params
    returns:      (B, 1) f32
    """
    w1, b1, w2, b2, w3, b3 = prepared_params
    B, S = global_state.shape
    A = all_actions.shape[1]
    K = S + A
    H1 = w1.shape[0]
    H2 = w2.shape[0]
    assert w1.shape[1] == K, (w1.shape, K)
    mm_dtype = w1.dtype

    # Fused concat + cast + transpose (feature-major activations, batch on lanes).
    xT = jnp.concatenate([global_state, all_actions], axis=1).astype(mm_dtype).T  # (K, B)

    tb, Bp, n_blocks = _pick_batch_tile(B, block_rows)
    if Bp != B:
        xT = jnp.pad(xT, ((0, 0), (0, Bp - B)))

    out_row = pl.pallas_call(
        _critic_kernel,
        out_shape=jax.ShapeDtypeStruct((1, Bp), jnp.float32),
        grid=(n_blocks,),
        in_specs=[
            # activations: tiled over the batch (lane) axis
            pl.BlockSpec((K, tb), lambda i: (0, i)),
            # weights / biases: full arrays, grid-invariant (constant index_map)
            pl.BlockSpec((H1, K), lambda i: (0, 0)),
            pl.BlockSpec((H1, 1), lambda i: (0, 0)),
            pl.BlockSpec((H2, H1), lambda i: (0, 0)),
            pl.BlockSpec((H2, 1), lambda i: (0, 0)),
            pl.BlockSpec((H2, 1), lambda i: (0, 0)),
            pl.BlockSpec((1, 1), lambda i: (0, 0)),
        ],
        out_specs=pl.BlockSpec((1, tb), lambda i: (0, i)),
        compiler_params=pltpu.CompilerParams(
            dimension_semantics=("parallel",)),
    )(xT, w1, b1, w2, b2, w3, b3)

    return out_row.reshape(-1)[:B].reshape(B, 1)


def init_ap_critic_params(key, global_state_dim, total_action_dim):
    """Deterministic init mimicking torch.nn.Linear defaults:
    weight, bias ~ U(-1/sqrt(fan_in), 1/sqrt(fan_in)).
    Weights are stored in PyTorch layout (out_features, in_features)."""
    in_dim = global_state_dim + total_action_dim
    layer_dims = [(512, in_dim), (256, 512), (1, 256)]
    params = []
    for fan_out, fan_in in layer_dims:
        key, kw, kb = jax.random.split(key, 3)
        bound = float(fan_in) ** -0.5
        w = jax.random.uniform(kw, (fan_out, fan_in), jnp.float32, -bound, bound)
        b = jax.random.uniform(kb, (fan_out,), jnp.float32, -bound, bound)
        params += [w, b]
    return tuple(params)


def _reference_forward(global_state, all_actions, params, use_bf16=True):
    """Plain-JAX reference with the same mixed-precision policy as the kernel."""
    w1, b1, w2, b2, w3, b3 = params
    dt = jnp.bfloat16 if use_bf16 else jnp.float32
    x = jnp.concatenate([global_state, all_actions], axis=1)
    h1 = jnp.maximum(jnp.dot(x.astype(dt), w1.T.astype(dt),
                             preferred_element_type=jnp.float32) + b1, 0.0)
    h2 = jnp.maximum(jnp.dot(h1.astype(dt), w2.T.astype(dt),
                             preferred_element_type=jnp.float32) + b2, 0.0)
    return h2 @ w3.T + b3


def _reference_forward_f32(global_state, all_actions, params):
    """Pure-f32 reference (matches the PyTorch module exactly)."""
    w1, b1, w2, b2, w3, b3 = params
    x = jnp.concatenate([global_state, all_actions], axis=1)
    h1 = jnp.maximum(x @ w1.T + b1, 0.0)
    h2 = jnp.maximum(h1 @ w2.T + b2, 0.0)
    return h2 @ w3.T + b3


if __name__ == "__main__":
    key = jax.random.PRNGKey(0)
    k_params, k_state, k_act = jax.random.split(key, 3)

    batch = 2
    global_state_dim = 16
    total_action_dim = 8

    params = init_ap_critic_params(k_params, global_state_dim, total_action_dim)
    prepared = prepare_ap_critic_params(params, use_bf16=True)  # hoisted out of the hot path

    global_state = jax.random.normal(k_state, (batch, global_state_dim), jnp.float32)
    all_actions = jax.random.normal(k_act, (batch, total_action_dim), jnp.float32)

    q_vals = jax.block_until_ready(ap_critic_forward(global_state, all_actions, prepared))
    ref = _reference_forward(global_state, all_actions, params, use_bf16=True)
    ref_f32 = _reference_forward_f32(global_state, all_actions, params)
    assert q_vals.shape == (batch, 1), q_vals.shape
    assert jnp.allclose(q_vals, ref, atol=1e-2, rtol=1e-2), (q_vals, ref)
    # bf16 matmul inputs vs. the exact f32 module: report (do not assert) the drift.
    _ = float(jnp.max(jnp.abs(q_vals - ref_f32)))

    # Multi-block grid path (batch padding, even block split for v7x's two TCs).
    k2s, k2a = jax.random.split(jax.random.PRNGKey(1))
    batch2 = 300
    gs2 = jax.random.normal(k2s, (batch2, global_state_dim), jnp.float32)
    aa2 = jax.random.normal(k2a, (batch2, total_action_dim), jnp.float32)
    q2 = jax.block_until_ready(ap_critic_forward(gs2, aa2, prepared))
    ref2 = _reference_forward(gs2, aa2, params, use_bf16=True)
    assert q2.shape == (batch2, 1), q2.shape
    assert jnp.allclose(q2, ref2, atol=1e-2, rtol=1e-2)

    # Small-tile path (block_rows=128 -> several minimal lane-tiles).
    q3 = jax.block_until_ready(ap_critic_forward(gs2, aa2, prepared, block_rows=128))
    assert jnp.allclose(q3, ref2, atol=1e-2, rtol=1e-2)

    print("KERNEL_OK")
</pallas_src>

<mosaic_0001>
module attributes {stable_mosaic.version = 11 : i64} {
  func.func @_critic_kernel(%arg0: i32, %arg1: memref<24x128xbf16, #tpu.memory_space<vmem>>, %arg2: memref<512x24xbf16, #tpu.memory_space<vmem>>, %arg3: memref<512x1xf32, #tpu.memory_space<vmem>>, %arg4: memref<256x512xbf16, #tpu.memory_space<vmem>>, %arg5: memref<256x1xf32, #tpu.memory_space<vmem>>, %arg6: memref<256x1xf32, #tpu.memory_space<vmem>>, %arg7: memref<1x1xf32, #tpu.memory_space<vmem>>, %arg8: memref<1x128xf32, #tpu.memory_space<vmem>>) attributes {dimension_semantics = [#tpu.dimension_semantics<parallel>], iteration_bounds = array<i64: 1>, scalar_prefetch = 0 : i64, scratch_operands = 0 : i64, tpu.core_type = #tpu.core_type<tc>, window_params = [{transform_indices = @transform_0, window_bounds = array<i64: 24, 128>}, {pipeline_mode = #tpu.pipeline_mode<synchronous>, transform_indices = @transform_1, window_bounds = array<i64: 512, 24>}, {pipeline_mode = #tpu.pipeline_mode<synchronous>, transform_indices = @transform_2, window_bounds = array<i64: 512, 1>}, {pipeline_mode = #tpu.pipeline_mode<synchronous>, transform_indices = @transform_3, window_bounds = array<i64: 256, 512>}, {pipeline_mode = #tpu.pipeline_mode<synchronous>, transform_indices = @transform_4, window_bounds = array<i64: 256, 1>}, {pipeline_mode = #tpu.pipeline_mode<synchronous>, transform_indices = @transform_5, window_bounds = array<i64: 256, 1>}, {pipeline_mode = #tpu.pipeline_mode<synchronous>, transform_indices = @transform_6, window_bounds = array<i64: 1, 1>}, {transform_indices = @transform_7, window_bounds = array<i64: 1, 128>}]} {
    %c0 = arith.constant 0 : index
    %c0_0 = arith.constant 0 : index
    %0 = vector.load %arg2[%c0, %c0_0] : memref<512x24xbf16, #tpu.memory_space<vmem>>, vector<512x24xbf16>
    %c0_1 = arith.constant 0 : index
    %c0_2 = arith.constant 0 : index
    %1 = vector.load %arg1[%c0_1, %c0_2] : memref<24x128xbf16, #tpu.memory_space<vmem>>, vector<24x128xbf16>
    %cst = arith.constant dense<0.000000e+00> : vector<512x128xf32>
    %2 = tpu.matmul %0, %1, %cst {dimension_numbers = #tpu.dot_dimension_numbers<[1], [0], [0], [1], [0, 0, 1, 1], [], []>} : vector<512x24xbf16>, vector<24x128xbf16>, vector<512x128xf32> -> vector<512x128xf32>
    %c0_3 = arith.constant 0 : index
    %c0_4 = arith.constant 0 : index
    %3 = vector.load %arg3[%c0_3, %c0_4] : memref<512x1xf32, #tpu.memory_space<vmem>>, vector<512x1xf32>
    %4 = vector.broadcast %3 : vector<512x1xf32> to vector<512x128xf32>
    %5 = arith.addf %2, %4 : vector<512x128xf32>
    %cst_5 = arith.constant 0.000000e+00 : f32
    %6 = vector.broadcast %cst_5 : f32 to vector<512x128xf32>
    %7 = arith.maximumf %5, %6 : vector<512x128xf32>
    %c0_6 = arith.constant 0 : index
    %c0_7 = arith.constant 0 : index
    %8 = vector.load %arg4[%c0_6, %c0_7] : memref<256x512xbf16, #tpu.memory_space<vmem>>, vector<256x512xbf16>
    %9 = arith.truncf %7 : vector<512x128xf32> to vector<512x128xbf16>
    %cst_8 = arith.constant dense<0.000000e+00> : vector<256x128xf32>
    %10 = tpu.matmul %8, %9, %cst_8 {dimension_numbers = #tpu.dot_dimension_numbers<[1], [0], [0], [1], [0, 0, 1, 1], [], []>} : vector<256x512xbf16>, vector<512x128xbf16>, vector<256x128xf32> -> vector<256x128xf32>
    %c0_9 = arith.constant 0 : index
    %c0_10 = arith.constant 0 : index
    %11 = vector.load %arg5[%c0_9, %c0_10] : memref<256x1xf32, #tpu.memory_space<vmem>>, vector<256x1xf32>
    %12 = vector.broadcast %11 : vector<256x1xf32> to vector<256x128xf32>
    %13 = arith.addf %10, %12 : vector<256x128xf32>
    %cst_11 = arith.constant 0.000000e+00 : f32
    %14 = vector.broadcast %cst_11 : f32 to vector<256x128xf32>
    %15 = arith.maximumf %13, %14 : vector<256x128xf32>
    %c0_12 = arith.constant 0 : index
    %c0_13 = arith.constant 0 : index
    %16 = vector.load %arg6[%c0_12, %c0_13] : memref<256x1xf32, #tpu.memory_space<vmem>>, vector<256x1xf32>
    %17 = vector.broadcast %16 : vector<256x1xf32> to vector<256x128xf32>
    %18 = arith.mulf %15, %17 : vector<256x128xf32>
    %cst_14 = arith.constant dense<0.000000e+00> : vector<128xf32>
    %19 = vector.multi_reduction <add>, %18, %cst_14 [0] : vector<256x128xf32> to vector<128xf32>
    %20 = vector.shape_cast %19 : vector<128xf32> to vector<1x128xf32>
    %c0_15 = arith.constant 0 : index
    %c0_16 = arith.constant 0 : index
    %21 = vector.load %arg7[%c0_15, %c0_16] : memref<1x1xf32, #tpu.memory_space<vmem>>, vector<1x1xf32>
    %22 = vector.broadcast %21 : vector<1x1xf32> to vector<1x128xf32>
    %23 = arith.addf %20, %22 : vector<1x128xf32>
    %c0_17 = arith.constant 0 : index
    %c0_18 = arith.constant 0 : index
    %24 = vector.load %arg8[%c0_17, %c0_18] : memref<1x128xf32, #tpu.memory_space<vmem>>, vector<1x128xf32>
    tpu.vector_store %arg8[%c0_17, %c0_18], %23 {strides = array<i32>} : memref<1x128xf32, #tpu.memory_space<vmem>>, vector<1x128xf32>,
    return
  }
  func.func @transform_0(%arg0: i32) -> (i32, i32) {
    %c0_i32 = arith.constant 0 : i32
    %c0_i32_0 = arith.constant 0 : i32
    return %c0_i32, %arg0 : i32, i32
  }
  func.func @transform_1(%arg0: i32) -> (i32, i32) {
    %c0_i32 = arith.constant 0 : i32
    %c0_i32_0 = arith.constant 0 : i32
    %c0_i32_1 = arith.constant 0 : i32
    return %c0_i32, %c0_i32_0 : i32, i32
  }
  func.func @transform_2(%arg0: i32) -> (i32, i32) {
    %c0_i32 = arith.constant 0 : i32
    %c0_i32_0 = arith.constant 0 : i32
    %c0_i32_1 = arith.constant 0 : i32
    return %c0_i32, %c0_i32_0 : i32, i32
  }
  func.func @transform_3(%arg0: i32) -> (i32, i32) {
    %c0_i32 = arith.constant 0 : i32
    %c0_i32_0 = arith.constant 0 : i32
    %c0_i32_1 = arith.constant 0 : i32
    return %c0_i32, %c0_i32_0 : i32, i32
  }
  func.func @transform_4(%arg0: i32) -> (i32, i32) {
    %c0_i32 = arith.constant 0 : i32
    %c0_i32_0 = arith.constant 0 : i32
    %c0_i32_1 = arith.constant 0 : i32
    return %c0_i32, %c0_i32_0 : i32, i32
  }
  func.func @transform_5(%arg0: i32) -> (i32, i32) {
    %c0_i32 = arith.constant 0 : i32
    %c0_i32_0 = arith.constant 0 : i32
    %c0_i32_1 = arith.constant 0 : i32
    return %c0_i32, %c0_i32_0 : i32, i32
  }
  func.func @transform_6(%arg0: i32) -> (i32, i32) {
    %c0_i32 = arith.constant 0 : i32
    %c0_i32_0 = arith.constant 0 : i32
    %c0_i32_1 = arith.constant 0 : i32
    return %c0_i32, %c0_i32_0 : i32, i32
  }
  func.func @transform_7(%arg0: i32) -> (i32, i32) {
    %c0_i32 = arith.constant 0 : i32
    %c0_i32_0 = arith.constant 0 : i32
    return %c0_i32, %arg0 : i32, i32
  }
}

</mosaic_0001>

<bundles_post_ra>
// kernel: ap_critic_forward.1
= control target key start
LH: loop header
LB: loop body
LE: loop exit
PB: predicated region body
PF: predicated region fallthrough
CT: control target
= control target key end

     0   :  { %v2937_v0 = vmov 0   ;;  %vm746_vm0 = vcmask 1043456   ;;  %vm649_vm1 = vcmask 195584   ;;  %s4003_s2 = inlined_call_operand.vmem [shape: f32[512,1], index: 2, kind: input, shape index: {}]   ;;  %s4004_s0 = inlined_call_operand.vmem [shape: bf16[24,128], index: 0, kind: input, shape index: {}]   ;;  %s4005_s1 = inlined_call_operand.vmem [shape: bf16[512,24], index: 1, kind: input, shape index: {}]   ;;  %s4006_s6 = inlined_call_operand.<no memory space> [shape: f32[1,1], index: 6, kind: input, shape index: {}]   ;;  %s4007_s4 = inlined_call_operand.vmem [shape: f32[256,1], index: 4, kind: input, shape index: {}]   ;;  %s4008_s3 = inlined_call_operand.vmem [shape: bf16[256,512], index: 3, kind: input, shape index: {}]   ;;  %s4009_s5 = inlined_call_operand.vmem [shape: f32[256,1], index: 5, kind: input, shape index: {}]   ;;  %s4010_s7 = inlined_call_operand.vmem [shape: f32[1,128], index: 7, kind: output, shape index: {}]  }
   0x1   :  { %2806 = vset.pattern.permute.xlu1 %v2937_v0  ;;  %2805 = vset.pattern.permute.xlu0 %v2937_v0  ;;  %v98_v1 = vld [vmem:[%s4003_s2 + $0x10] sm:$0xff]  ;;  %v96_v2 = vld [vmem:[%s4003_s2] sm:$0xff]  ;;  %v99_v4 = vld [vmem:[%s4003_s2 + $0x18] sm:$0xff] }
   0x2   :  { %172 = vperm.xlu1 %2806, %v98_v1   ;;  %162 = vperm.xlu0 %2805, %v96_v2   ;;  %v2807_v3 = vld [vmem:[%s4004_s0] sm:$0xff]   ;;  %v97_v5 = vld [vmem:[%s4003_s2 + $0x8] sm:$0xff]  ;;  %v103_v14 = vld [vmem:[%s4003_s2 + $0x38] sm:$0xff] }
   0x3   :  { %v2808_v6 = vld [vmem:[%s4004_s0 + $0x8] ss:$0 sps:$4 sm:$0xff]   ;;  %2730 = vmatprep.subr.bf16.mxu0 %v2807_v3  ;;  %2798 = vmatprep.subr.bf16.mxu1 %v2807_v3  ;;  %v2809_v8 = vld [vmem:[%s4005_s1] sm:$0xff]   ;;  %v102_v15 = vld [vmem:[%s4003_s2 + $0x30] sm:$0xff] }
   0x4   :  { %2731 = vmatpush3.bf16.msra.mxu0 %v2807_v3  ;;  %2800 = vmatpush3.bf16.msra.mxu1 %v2807_v3  ;;  %v101_v7 = vld [vmem:[%s4003_s2 + $0x28] sm:$0xff]  ;;  %v748_v9 = vsel %vm746_vm0, %v2808_v6, 0  ;;  %v2810_v10 = vld [vmem:[%s4005_s1 + $0x80] sm:$0xff]   ;;  %v2813_v16 = vld [vmem:[%s4005_s1 + $0x10] sm:$0xff]  }
   0x5   :  { %2802 = vmatprep.subr.msk.bf16.mxu0 %vm746_vm0, %v2808_v6  ;;  %2803 = vmatprep.subr.msk.bf16.mxu1 %vm746_vm0, %v2808_v6  ;;  %v100_v11 = vld [vmem:[%s4003_s2 + $0x20] sm:$0xff]  ;;  %v2811_v12 = vld [vmem:[%s4005_s1 + $0x8] sm:$0xff]   ;;  %v2814_v17 = vld [vmem:[%s4005_s1 + $0x90] sm:$0xff]  }
   0x6   :  { %177 = vperm.xlu1 %2806, %v99_v4   ;;  %167 = vperm.xlu0 %2805, %v97_v5   ;;  %v2812_v13 = vld [vmem:[%s4005_s1 + $0x88] sm:$0xff]   ;;  %v104_v19 = vld [vmem:[%s4003_s2 + $0x40] sm:$0xff]  ;;  %v2815_v20 = vld [vmem:[%s4005_s1 + $0x18] sm:$0xff]  }
   0x7   :  { %2734 = vmatprep.mubr.msk.bf16.mxu0 %vm649_vm1, %v2809_v8  ;;  %2766 = vmatprep.mubr.msk.bf16.mxu1 %vm649_vm1, %v2810_v10  ;;  %v105_v18 = vld [vmem:[%s4003_s2 + $0x48] sm:$0xff]  ;;  %v2816_v21 = vld [vmem:[%s4005_s1 + $0x98] sm:$0xff]   ;;  %v2817_v22 = vld [vmem:[%s4005_s1 + $0x20] sm:$0xff]  }
   0x8   :  { %2733 = vmatpush3.bf16.msra.mxu0 %v748_v9  ;;  %2801 = vmatpush3.bf16.msra.mxu1 %v748_v9  ;;  %v2818_v23 = vld [vmem:[%s4005_s1 + $0xa0] sm:$0xff]   ;;  %v107_v24 = vld [vmem:[%s4003_s2 + $0x58] sm:$0xff]  ;;  %v106_v25 = vld [vmem:[%s4003_s2 + $0x50] sm:$0xff] }
   0x9   :  { %v112_v26 = vld [vmem:[%s4003_s2 + $0x80] sm:$0xff]  ;;  %v2819_v28 = vld [vmem:[%s4005_s1 + $0x28] sm:$0xff]   ;;  %v2821_v30 = vld [vmem:[%s4005_s1 + $0x30] sm:$0xff]  }
   0xa   :  { %187 = vperm.xlu1 %2806, %v101_v7   ;;  %182 = vperm.xlu0 %2805, %v100_v11   ;;  %v108_v27 = vld [vmem:[%s4003_s2 + $0x60] sm:$0xff]  ;;  %v2820_v29 = vld [vmem:[%s4005_s1 + $0xa8] sm:$0xff]   ;;  %v2822_v31 = vld [vmem:[%s4005_s1 + $0xb0] sm:$0xff]  }
   0xb   :  { %2735 = vmatmul.mubr.msk.bf16.vlgmr.msra.gmra.mrb[0].mxu0 %vm649_vm1, %v2811_v12  ;;  %2767 = vmatmul.mubr.msk.bf16.vlgmr.msra.gmra.mrb[0].mxu1 %vm649_vm1, %v2812_v13  ;;  %v144_v32 = vld [vmem:[%s4003_s2 + $0x180] sm:$0xff]  ;;  %v113_v33 = vld [vmem:[%s4003_s2 + $0x88] sm:$0xff]  ;;  %v2823_v36 = vld [vmem:[%s4005_s1 + $0x38] sm:$0xff]  }
   0xc   :  { %2738 = vmatprep.mubr.msk.bf16.mxu0 %vm649_vm1, %v2813_v16  ;;  %2770 = vmatprep.mubr.msk.bf16.mxu1 %vm649_vm1, %v2814_v17  ;;  %v128_v34 = vld [vmem:[%s4003_s2 + $0x100] sm:$0xff]  ;;  %v145_v35 = vld [vmem:[%s4003_s2 + $0x188] sm:$0xff]  ;;  %v2824_v37 = vld [vmem:[%s4005_s1 + $0xb8] sm:$0xff]  }
   0xd   :  { %v2825_v38 = vld [vmem:[%s4005_s1 + $0x40] sm:$0xff]   ;;  %v114_v40 = vld [vmem:[%s4003_s2 + $0x90] sm:$0xff]  ;;  %v129_v41 = vld [vmem:[%s4003_s2 + $0x108] sm:$0xff] }
   0xe   :  { %197 = vperm.xlu1 %2806, %v103_v14   ;;  %192 = vperm.xlu0 %2805, %v102_v15   ;;  %v2826_v39 = vld [vmem:[%s4005_s1 + $0xc0] sm:$0xff]   ;;  %v146_v42 = vld [vmem:[%s4003_s2 + $0x190] sm:$0xff]  ;;  %v115_v43 = vld [vmem:[%s4003_s2 + $0x98] sm:$0xff] }
   0xf   :  { %v2827_v44 = vld [vmem:[%s4005_s1 + $0x48] sm:$0xff]   ;;  %v2829_v46 = vld [vmem:[%s4005_s1 + $0x50] sm:$0xff]   ;;  %v147_v49 = vld [vmem:[%s4003_s2 + $0x198] sm:$0xff] }
  0x10   :  { %v2828_v45 = vld [vmem:[%s4005_s1 + $0xc8] sm:$0xff]   ;;  %v2830_v47 = vld [vmem:[%s4005_s1 + $0xd0] sm:$0xff]   ;;  %v116_v50 = vld [vmem:[%s4003_s2 + $0xa0] sm:$0xff] }
  0x11   :  { %v130_v48 = vld [vmem:[%s4003_s2 + $0x110] sm:$0xff]  ;;  %v131_v51 = vld [vmem:[%s4003_s2 + $0x118] sm:$0xff]  ;;  %v2833_v54 = vld [vmem:[%s4005_s1 + $0x60] sm:$0xff]  }
  0x12   :  { %207 = vperm.xlu1 %2806, %v105_v18   ;;  %202 = vperm.xlu0 %2805, %v104_v19   ;;  %v2831_v52 = vld [vmem:[%s4005_s1 + $0x58] sm:$0xff]   ;;  %v2834_v55 = vld [vmem:[%s4005_s1 + $0xe0] sm:$0xff]   ;;  %v117_v57 = vld [vmem:[%s4003_s2 + $0xa8] sm:$0xff] }
  0x13   :  { %2739 = vmatmul.mubr.msk.bf16.gmra.mrb[4].mxu0 %vm649_vm1, %v2815_v20  ;;  %2771 = vmatmul.mubr.msk.bf16.gmra.mrb[4].mxu1 %vm649_vm1, %v2816_v21  ;;  %v2832_v53 = vld [vmem:[%s4005_s1 + $0xd8] sm:$0xff]   ;;  %v148_v56 = vld [vmem:[%s4003_s2 + $0x1a0] sm:$0xff]  ;;  %v149_v59 = vld [vmem:[%s4003_s2 + $0x1a8] sm:$0xff] }
  0x14   :  { %2742 = vmatprep.mubr.msk.bf16.mxu0 %vm649_vm1, %v2817_v22  ;;  %2774 = vmatprep.mubr.msk.bf16.mxu1 %vm649_vm1, %v2818_v23  ;;  %v132_v58 = vld [vmem:[%s4003_s2 + $0x120] sm:$0xff]  ;;  %v2835_v60 = vld [vmem:[%s4005_s1 + $0x68] sm:$0xff]   ;;  %v2837_v62 = vld [vmem:[%s4005_s1 + $0x70] sm:$0xff]  }
  0x15   :  { %v2836_v61 = vld [vmem:[%s4005_s1 + $0xe8] sm:$0xff]   ;;  %v2838_v63 = vld [vmem:[%s4005_s1 + $0xf0] sm:$0xff]   ;;  %v119_v3 = vld [vmem:[%s4003_s2 + $0xb8] sm:$0xff] }
  0x16   :  { %217 = vperm.xlu1 %2806, %v107_v24   ;;  %212 = vperm.xlu0 %2805, %v106_v25   ;;  %v118_v0 = vld [vmem:[%s4003_s2 + $0xb0] sm:$0xff]  ;;  %v133_v1 = vld [vmem:[%s4003_s2 + $0x128] sm:$0xff]  ;;  %v2839_v4 = vld [vmem:[%s4005_s1 + $0x78] sm:$0xff]  }
  0x17   :  { %v150_v2 = vld [vmem:[%s4003_s2 + $0x1b0] sm:$0xff]  ;;  %v2840_v5 = vld [vmem:[%s4005_s1 + $0xf8] sm:$0xff]   ;;  %v120_v8 = vld [vmem:[%s4003_s2 + $0xc0] sm:$0xff] }
  0x18   :  { %v134_v6 = vld [vmem:[%s4003_s2 + $0x130] sm:$0xff]  ;;  %v151_v7 = vld [vmem:[%s4003_s2 + $0x1b8] sm:$0xff]  ;;  %v152_v10 = vld [vmem:[%s4003_s2 + $0x1c0] sm:$0xff] }
  0x19   :  { %v135_v9 = vld [vmem:[%s4003_s2 + $0x138] sm:$0xff]  ;;  %v121_v11 = vld [vmem:[%s4003_s2 + $0xc8] sm:$0xff]  ;;  %v136_v12 = vld [vmem:[%s4003_s2 + $0x140] sm:$0xff] }
  0x1a   :  { %242 = vperm.xlu1 %2806, %v112_v26   ;;  %222 = vperm.xlu0 %2805, %v108_v27   ;;  %v153_v13 = vld [vmem:[%s4003_s2 + $0x1c8] sm:$0xff]  ;;  %v122_v14 = vld [vmem:[%s4003_s2 + $0xd0] sm:$0xff]  ;;  %v123_v17 = vld [vmem:[%s4003_s2 + $0xd8] sm:$0xff] }
  0x1b   :  { %2743 = vmatmul.mubr.msk.bf16.gmra.mrb[8].mxu0 %vm649_vm1, %v2819_v28  ;;  %2775 = vmatmul.mubr.msk.bf16.gmra.mrb[8].mxu1 %vm649_vm1, %v2820_v29  ;;  %v137_v15 = vld [vmem:[%s4003_s2 + $0x148] sm:$0xff]  ;;  %v154_v16 = vld [vmem:[%s4003_s2 + $0x1d0] sm:$0xff]  ;;  %v155_v19 = vld [vmem:[%s4003_s2 + $0x1d8] sm:$0xff] }
  0x1c   :  { %2746 = vmatprep.mubr.msk.bf16.mxu0 %vm649_vm1, %v2821_v30  ;;  %2778 = vmatprep.mubr.msk.bf16.mxu1 %vm649_vm1, %v2822_v31  ;;  %v138_v18 = vld [vmem:[%s4003_s2 + $0x150] sm:$0xff]  ;;  %v124_v20 = vld [vmem:[%s4003_s2 + $0xe0] sm:$0xff]  ;;  %v139_v21 = vld [vmem:[%s4003_s2 + $0x158] sm:$0xff] }
  0x1d   :  { %v109_v22 = vld [vmem:[%s4003_s2 + $0x68] sm:$0xff]  ;;  %v156_v25 = vld [vmem:[%s4003_s2 + $0x1e0] sm:$0xff]  ;;  %v127_v28 = vld [vmem:[%s4003_s2 + $0xf8] sm:$0xff] }
  0x1e   :  { %402 = vperm.xlu1 %2806, %v144_v32   ;;  %247 = vperm.xlu0 %2805, %v113_v33   ;;  %v125_v23 = vld [vmem:[%s4003_s2 + $0xe8] sm:$0xff]  ;;  %v140_v27 = vld [vmem:[%s4003_s2 + $0x160] sm:$0xff]  ;;  %v126_v29 = vld [vmem:[%s4003_s2 + $0xf0] sm:$0xff] }
  0x1f   :  { %v157_v24 = vld [vmem:[%s4003_s2 + $0x1e8] sm:$0xff]  ;;  %v111_v30 = vld [vmem:[%s4003_s2 + $0x78] sm:$0xff]  ;;  %v110_v31 = vld [vmem:[%s4003_s2 + $0x70] sm:$0xff] }
  0x20   :  { %v141_v26 = vld [vmem:[%s4003_s2 + $0x168] sm:$0xff]  ;;  %v159_v32 = vld [vmem:[%s4003_s2 + $0x1f8] sm:$0xff]  ;;  %v158_v33 = vld [vmem:[%s4003_s2 + $0x1f0] sm:$0xff] }
  0x22   :  { %322 = vperm.xlu1 %2806, %v128_v34   ;;  %407 = vperm.xlu0 %2805, %v145_v35   ;;  %v143_v34 = vld [vmem:[%s4003_s2 + $0x178] sm:$0xff]  ;;  %v142_v35 = vld [vmem:[%s4003_s2 + $0x170] sm:$0xff] }
  0x23   :  { %2747 = vmatmul.mubr.msk.bf16.gmra.mrb[12].mxu0 %vm649_vm1, %v2823_v36  ;;  %2779 = vmatmul.mubr.msk.bf16.gmra.mrb[12].mxu1 %vm649_vm1, %v2824_v37  ;;  %v12_v36 = vstv %s4006_s6  ;;  %v1200_v37 = vld [vmem:[%s4007_s4 + $0x8] sm:$0xff] }
  0x24   :  { %2750 = vmatprep.mubr.msk.bf16.mxu0 %vm649_vm1, %v2825_v38  ;;  %2782 = vmatprep.mubr.msk.bf16.mxu1 %vm649_vm1, %v2826_v39  ;;  %13 = vst [vmem:[#allocation2] sm:$0x1] %v12_v36  ;;  %v1199_v38 = vld [vmem:[%s4007_s4] sm:$0xff] }
  0x25   :  { %v2065_v36 = vld [vmem:[%s4009_s5] sm:$0xff] }
  0x26   :  { %252 = vperm.xlu1 %2806, %v114_v40   ;;  %327 = vperm.xlu0 %2805, %v129_v41   ;;  %v1202_v41 = vld [vmem:[%s4007_s4 + $0x18] sm:$0xff] }
  0x2a   :  { %412 = vperm.xlu1 %2806, %v146_v42   ;;  %257 = vperm.xlu0 %2805, %v115_v43   ;;  %v1201_v42 = vld [vmem:[%s4007_s4 + $0x10] sm:$0xff] }
  0x2b   :  { %2751 = vmatmul.mubr.msk.bf16.gmra.mrb[16].mxu0 %vm649_vm1, %v2827_v44  ;;  %2783 = vmatmul.mubr.msk.bf16.gmra.mrb[16].mxu1 %vm649_vm1, %v2828_v45  ;;  %v1204_v45 = vld [vmem:[%s4007_s4 + $0x28] sm:$0xff] }
  0x2c   :  { %2754 = vmatprep.mubr.msk.bf16.mxu0 %vm649_vm1, %v2829_v46  ;;  %2786 = vmatprep.mubr.msk.bf16.mxu1 %vm649_vm1, %v2830_v47  ;;  %v1203_v46 = vld [vmem:[%s4007_s4 + $0x20] sm:$0xff] }
  0x2e   :  { %332 = vperm.xlu1 %2806, %v130_v48   ;;  %417 = vperm.xlu0 %2805, %v147_v49   ;;  %v1206_v49 = vld [vmem:[%s4007_s4 + $0x38] sm:$0xff] }
  0x32   :  { %262 = vperm.xlu1 %2806, %v116_v50   ;;  %337 = vperm.xlu0 %2805, %v131_v51   ;;  %v1205_v50 = vld [vmem:[%s4007_s4 + $0x30] sm:$0xff] }
  0x33   :  { %2755 = vmatmul.mubr.msk.bf16.gmra.mrb[20].mxu0 %vm649_vm1, %v2831_v52  ;;  %2787 = vmatmul.mubr.msk.bf16.gmra.mrb[20].mxu1 %vm649_vm1, %v2832_v53  ;;  %v1208_v53 = vld [vmem:[%s4007_s4 + $0x48] sm:$0xff] }
  0x34   :  { %2758 = vmatprep.mubr.msk.bf16.mxu0 %vm649_vm1, %v2833_v54  ;;  %2790 = vmatprep.mubr.msk.bf16.mxu1 %vm649_vm1, %v2834_v55  ;;  %v1207_v54 = vld [vmem:[%s4007_s4 + $0x40] sm:$0xff] }
  0x36   :  { %422 = vperm.xlu1 %2806, %v148_v56   ;;  %267 = vperm.xlu0 %2805, %v117_v57   ;;  %v1210_v57 = vld [vmem:[%s4007_s4 + $0x58] sm:$0xff] }
  0x3a   :  { %342 = vperm.xlu1 %2806, %v132_v58   ;;  %427 = vperm.xlu0 %2805, %v149_v59   ;;  %v1209_v58 = vld [vmem:[%s4007_s4 + $0x50] sm:$0xff] }
  0x3b   :  { %2759 = vmatmul.mubr.msk.bf16.gmra.mrb[24].mxu0 %vm649_vm1, %v2835_v60  ;;  %2791 = vmatmul.mubr.msk.bf16.gmra.mrb[24].mxu1 %vm649_vm1, %v2836_v61  ;;  %v1212_v61 = vld [vmem:[%s4007_s4 + $0x68] sm:$0xff] }
  0x3c   :  { %2762 = vmatprep.mubr.msk.bf16.mxu0 %vm649_vm1, %v2837_v62  ;;  %2794 = vmatprep.mubr.msk.bf16.mxu1 %vm649_vm1, %v2838_v63  ;;  %v1211_v62 = vld [vmem:[%s4007_s4 + $0x60] sm:$0xff] }
  0x3e   :  { %272 = vperm.xlu1 %2806, %v118_v0   ;;  %347 = vperm.xlu0 %2805, %v133_v1   ;;  %v1214_v1 = vld [vmem:[%s4007_s4 + $0x78] sm:$0xff] }
  0x42   :  { %432 = vperm.xlu1 %2806, %v150_v2   ;;  %277 = vperm.xlu0 %2805, %v119_v3   ;;  %v1213_v2 = vld [vmem:[%s4007_s4 + $0x70] sm:$0xff] }
  0x43   :  { %2763 = vmatmul.mubr.msk.bf16.gmra.mrb[28].mxu0 %vm649_vm1, %v2839_v4  ;;  %2795 = vmatmul.mubr.msk.bf16.gmra.mrb[28].mxu1 %vm649_vm1, %v2840_v5  ;;  %v1216_v5 = vld [vmem:[%s4007_s4 + $0x88] sm:$0xff] }
  0x46   :  { %352 = vperm.xlu1 %2806, %v134_v6   ;;  %437 = vperm.xlu0 %2805, %v151_v7   ;;  %v1215_v6 = vld [vmem:[%s4007_s4 + $0x80] sm:$0xff] }
  0x4a   :  { %282 = vperm.xlu1 %2806, %v120_v8   ;;  %357 = vperm.xlu0 %2805, %v135_v9   ;;  %v1218_v9 = vld [vmem:[%s4007_s4 + $0x98] sm:$0xff] }
  0x4e   :  { %442 = vperm.xlu1 %2806, %v152_v10   ;;  %287 = vperm.xlu0 %2805, %v121_v11   ;;  %v1217_v10 = vld [vmem:[%s4007_s4 + $0x90] sm:$0xff] }
  0x52   :  { %362 = vperm.xlu1 %2806, %v136_v12   ;;  %447 = vperm.xlu0 %2805, %v153_v13   ;;  %v1220_v13 = vld [vmem:[%s4007_s4 + $0xa8] sm:$0xff] }
  0x56   :  { %292 = vperm.xlu1 %2806, %v122_v14   ;;  %367 = vperm.xlu0 %2805, %v137_v15   ;;  %v1219_v14 = vld [vmem:[%s4007_s4 + $0xa0] sm:$0xff] }
  0x5a   :  { %452 = vperm.xlu1 %2806, %v154_v16   ;;  %297 = vperm.xlu0 %2805, %v123_v17   ;;  %v1222_v17 = vld [vmem:[%s4007_s4 + $0xb8] sm:$0xff] }
  0x5e   :  { %372 = vperm.xlu1 %2806, %v138_v18   ;;  %457 = vperm.xlu0 %2805, %v155_v19   ;;  %v2843_v18 = vld [vmem:[%s4008_s3 + $0x4] ss:$16 sps:$4 sm:$0xff]  }
  0x5f   :  { %v1221_v19 = vld [vmem:[%s4007_s4 + $0xb0] sm:$0xff]  ;;  %1743 = vmatprep.mubr.bf16.mxu1 %v2843_v18  ;;  %v2077_v18 = vld [vmem:[%s4009_s5 + $0x60] sm:$0xff] }
  0x62   :  { %302 = vperm.xlu1 %2806, %v124_v20   ;;  %377 = vperm.xlu0 %2805, %v139_v21   ;;  %v2846_v20 = vld [vmem:[%s4008_s3 + $0xc] ss:$16 sps:$4 sm:$0xff]  }
  0x63   :  { %1904 = vmatprep.mubr.bf16.mxu0 %v2846_v20 }
  0x66   :  { %227 = vperm.xlu1 %2806, %v109_v22   ;;  %307 = vperm.xlu0 %2805, %v125_v23   ;;  %v1224_v23 = vld [vmem:[%s4007_s4 + $0xc8] sm:$0xff] }
  0x6a   :  { %467 = vperm.xlu1 %2806, %v157_v24   ;;  %462 = vperm.xlu0 %2805, %v156_v25   ;;  %v1223_v24 = vld [vmem:[%s4007_s4 + $0xc0] sm:$0xff] }
  0x6e   :  { %387 = vperm.xlu1 %2806, %v141_v26   ;;  %382 = vperm.xlu0 %2805, %v140_v27   ;;  %v1226_v27 = vld [vmem:[%s4007_s4 + $0xd8] sm:$0xff] }
  0x72   :  { %317 = vperm.xlu1 %2806, %v127_v28   ;;  %312 = vperm.xlu0 %2805, %v126_v29   ;;  %v1225_v28 = vld [vmem:[%s4007_s4 + $0xd0] sm:$0xff] }
  0x76   :  { %237 = vperm.xlu1 %2806, %v111_v30   ;;  %232 = vperm.xlu0 %2805, %v110_v31   ;;  %v1228_v31 = vld [vmem:[%s4007_s4 + $0xe8] sm:$0xff] }
  0x7a   :  { %477 = vperm.xlu1 %2806, %v159_v32   ;;  %472 = vperm.xlu0 %2805, %v158_v33   ;;  %v1227_v32 = vld [vmem:[%s4007_s4 + $0xe0] sm:$0xff] }
  0x7e   :  { %397 = vperm.xlu1 %2806, %v143_v34   ;;  %392 = vperm.xlu0 %2805, %v142_v35   ;;  %v2066_v35 = vld [vmem:[%s4009_s5 + $0x8] sm:$0xff] }
  0x81   :  { %v3313_v39 = vpop.permute.xlu1 %172  ;;  %v3315_v40 = vpop.permute.xlu0 %162 }
  0x82   :  { %1238 = vperm.xlu1 %2806, %v1200_v37   ;;  %1233 = vperm.xlu0 %2805, %v1199_v38  }
  0x85   :  { %v3323_v43 = vpop.permute.xlu1 %177  ;;  %v3325_v44 = vpop.permute.xlu0 %167 }
  0x86   :  { %1248 = vperm.xlu1 %2806, %v1202_v41   ;;  %1243 = vperm.xlu0 %2805, %v1201_v42   ;;  %v2068_v41 = vld [vmem:[%s4009_s5 + $0x18] sm:$0xff]  ;;  %v2067_v42 = vld [vmem:[%s4009_s5 + $0x10] sm:$0xff] }
  0x89   :  { %v3333_v47 = vpop.permute.xlu1 %187  ;;  %v3335_v48 = vpop.permute.xlu0 %182 }
  0x8a   :  { %1258 = vperm.xlu1 %2806, %v1204_v45   ;;  %1253 = vperm.xlu0 %2805, %v1203_v46  }
  0x8d   :  { %v3343_v51 = vpop.permute.xlu1 %197  ;;  %v3345_v52 = vpop.permute.xlu0 %192 }
  0x8e   :  { %1268 = vperm.xlu1 %2806, %v1206_v49   ;;  %1263 = vperm.xlu0 %2805, %v1205_v50   ;;  %v2070_v49 = vld [vmem:[%s4009_s5 + $0x28] sm:$0xff]  ;;  %v2069_v50 = vld [vmem:[%s4009_s5 + $0x20] sm:$0xff] }
  0x91   :  { %v3353_v55 = vpop.permute.xlu1 %207  ;;  %v3355_v56 = vpop.permute.xlu0 %202 }
  0x92   :  { %1278 = vperm.xlu1 %2806, %v1208_v53   ;;  %1273 = vperm.xlu0 %2805, %v1207_v54  }
  0x95   :  { %v3363_v59 = vpop.permute.xlu1 %217  ;;  %v3365_v60 = vpop.permute.xlu0 %212 }
  0x96   :  { %1288 = vperm.xlu1 %2806, %v1210_v57   ;;  %1283 = vperm.xlu0 %2805, %v1209_v58   ;;  %v2072_v57 = vld [vmem:[%s4009_s5 + $0x38] sm:$0xff]  ;;  %v2071_v58 = vld [vmem:[%s4009_s5 + $0x30] sm:$0xff] }
  0x99   :  { %v3373_v63 = vpop.permute.xlu1 %242  ;;  %v3375_v0 = vpop.permute.xlu0 %222 }
  0x9a   :  { %1298 = vperm.xlu1 %2806, %v1212_v61   ;;  %1293 = vperm.xlu0 %2805, %v1211_v62  }
  0x9d   :  { %v3383_v3 = vpop.permute.xlu1 %402  ;;  %v3385_v4 = vpop.permute.xlu0 %247 }
  0x9e   :  { %1308 = vperm.xlu1 %2806, %v1214_v1   ;;  %1303 = vperm.xlu0 %2805, %v1213_v2   ;;  %v2074_v1 = vld [vmem:[%s4009_s5 + $0x48] sm:$0xff]  ;;  %v2073_v2 = vld [vmem:[%s4009_s5 + $0x40] sm:$0xff] }
  0xa1   :  { %v3393_v7 = vpop.permute.xlu1 %322  ;;  %v3395_v8 = vpop.permute.xlu0 %407 }
  0xa2   :  { %1318 = vperm.xlu1 %2806, %v1216_v5   ;;  %1313 = vperm.xlu0 %2805, %v1215_v6  }
  0xa5   :  { %v3403_v11 = vpop.permute.xlu1 %252  ;;  %v3405_v12 = vpop.permute.xlu0 %327 }
  0xa6   :  { %1328 = vperm.xlu1 %2806, %v1218_v9   ;;  %1323 = vperm.xlu0 %2805, %v1217_v10   ;;  %v2076_v9 = vld [vmem:[%s4009_s5 + $0x58] sm:$0xff]  ;;  %v2075_v10 = vld [vmem:[%s4009_s5 + $0x50] sm:$0xff] }
  0xa9   :  { %v3413_v15 = vpop.permute.xlu1 %412  ;;  %v3415_v16 = vpop.permute.xlu0 %257 }
  0xaa   :  { %1338 = vperm.xlu1 %2806, %v1220_v13   ;;  %1333 = vperm.xlu0 %2805, %v1219_v14  }
  0xad   :  { %v3429_v21 = vpop.permute.xlu1 %332  ;;  %v3431_v22 = vpop.permute.xlu0 %417 }
  0xae   :  { %1348 = vperm.xlu1 %2806, %v1222_v17   ;;  %1343 = vperm.xlu0 %2805, %v1221_v19   ;;  %v2078_v17 = vld [vmem:[%s4009_s5 + $0x68] sm:$0xff] }
  0xb1   :  { %v3439_v25 = vpop.permute.xlu1 %262  ;;  %v3441_v26 = vpop.permute.xlu0 %337 }
  0xb2   :  { %1358 = vperm.xlu1 %2806, %v1224_v23   ;;  %1353 = vperm.xlu0 %2805, %v1223_v24   ;;  %v2080_v23 = vld [vmem:[%s4009_s5 + $0x78] sm:$0xff]  ;;  %v2079_v24 = vld [vmem:[%s4009_s5 + $0x70] sm:$0xff] }
  0xb5   :  { %v3449_v29 = vpop.permute.xlu1 %422  ;;  %v3451_v30 = vpop.permute.xlu0 %267 }
  0xb6   :  { %1368 = vperm.xlu1 %2806, %v1226_v27   ;;  %1363 = vperm.xlu0 %2805, %v1225_v28  }
  0xb9   :  { %v3459_v33 = vpop.permute.xlu1 %342  ;;  %v3461_v34 = vpop.permute.xlu0 %427 }
  0xba   :  { %1378 = vperm.xlu1 %2806, %v1228_v31   ;;  %1373 = vperm.xlu0 %2805, %v1227_v32   ;;  %v2082_v31 = vld [vmem:[%s4009_s5 + $0x88] sm:$0xff]  ;;  %v2081_v32 = vld [vmem:[%s4009_s5 + $0x80] sm:$0xff] }
  0xbd   :  { %v3469_v37 = vpop.permute.xlu1 %272  ;;  %v3471_v38 = vpop.permute.xlu0 %347 }
  0xbe   :  { %2104 = vperm.xlu1 %2806, %v2066_v35   ;;  %2099 = vperm.xlu0 %2805, %v2065_v36  }
  0xc1   :  { %v3479_v45 = vpop.permute.xlu1 %432  ;;  %v3481_v46 = vpop.permute.xlu0 %277 }
  0xc2   :  { %2114 = vperm.xlu1 %2806, %v2068_v41   ;;  %2109 = vperm.xlu0 %2805, %v2067_v42  }
  0xc5   :  { %v3489_v53 = vpop.permute.xlu1 %352  ;;  %v3491_v54 = vpop.permute.xlu0 %437 }
  0xc6   :  { %2124 = vperm.xlu1 %2806, %v2070_v49   ;;  %2119 = vperm.xlu0 %2805, %v2069_v50   ;;  %v2084_v49 = vld [vmem:[%s4009_s5 + $0x98] sm:$0xff]  ;;  %v2083_v50 = vld [vmem:[%s4009_s5 + $0x90] sm:$0xff] }
  0xc9   :  { %v3499_v61 = vpop.permute.xlu1 %282  ;;  %v3501_v62 = vpop.permute.xlu0 %357 }
  0xca   :  { %2134 = vperm.xlu1 %2806, %v2072_v57   ;;  %2129 = vperm.xlu0 %2805, %v2071_v58  }
  0xcd   :  { %v3509_v5 = vpop.permute.xlu1 %442  ;;  %v3511_v6 = vpop.permute.xlu0 %287 }
  0xce   :  { %4011 = vst [vmem:[#allocation3_spill] sm:$0xff] %v3511_v6  ;;  %2144 = vperm.xlu1 %2806, %v2074_v1   ;;  %2139 = vperm.xlu0 %2805, %v2073_v2  }
  0xd1   :  { %v3519_v13 = vpop.permute.xlu1 %362  ;;  %v3521_v14 = vpop.permute.xlu0 %447 }
  0xd2   :  { %4012 = vst [vmem:[#allocation4_spill] sm:$0xff] %v3521_v14  ;;  %2154 = vperm.xlu1 %2806, %v2076_v9   ;;  %2149 = vperm.xlu0 %2805, %v2075_v10  }
  0xd5   :  { %v3529_v19 = vpop.permute.xlu1 %292  ;;  %v3531_v20 = vpop.permute.xlu0 %367 }
  0xd6   :  { %2164 = vperm.xlu1 %2806, %v2078_v17   ;;  %2159 = vperm.xlu0 %2805, %v2077_v18  }
  0xd9   :  { %v3539_v27 = vpop.permute.xlu1 %452  ;;  %v3541_v28 = vpop.permute.xlu0 %297 }
  0xda   :  { %2174 = vperm.xlu1 %2806, %v2080_v23   ;;  %2169 = vperm.xlu0 %2805, %v2079_v24  }
  0xdd   :  { %v3549_v35 = vpop.permute.xlu1 %372  ;;  %v3551_v36 = vpop.permute.xlu0 %457 }
  0xde   :  { %4013 = vst [vmem:[#allocation5_spill] sm:$0xff] %v3551_v36  ;;  %2184 = vperm.xlu1 %2806, %v2082_v31   ;;  %2179 = vperm.xlu0 %2805, %v2081_v32   ;;  %v2736_v41 = vpop.f32.mrb[0].mxu0  ;;  %v2768_v42 = vpop.f32.mrb[0].mxu1 }
  0xdf   :  { %v784_v57 = vpop.f32.mrb[1].mxu0  ;;  %v912_v58 = vpop.f32.mrb[1].mxu1  ;;  %v793_v1 = vadd.f32 %v2736_v41, %v3313_v39  ;;  %v921_v2 = vadd.f32 %v2768_v42, %v3429_v21  ;;  %v2085_v21 = vld [vmem:[%s4009_s5 + $0xa0] sm:$0xff] }
  0xe0   :  { %v913_v9 = vadd.f32 %v912_v58, %v3393_v7  ;;  %v785_v18 = vadd.f32 %v784_v57, %v3315_v40  ;;  %v2737_v23 = vpop.f32.mrb[2].mxu0  ;;  %v2769_v24 = vpop.f32.mrb[2].mxu1  ;;  %v2086_v7 = vld [vmem:[%s4009_s5 + $0xa8] sm:$0xff] }
  0xe1   :  { %v3562_v10 = vpop.permute.xlu1 %302  ;;  %v3564_v17 = vpop.permute.xlu0 %377  ;;  %v796_v31 = vadd.f32 %v2737_v23, %v3323_v43  ;;  %v924_v32 = vadd.f32 %v2769_v24, %v3441_v26  ;;  %v1041_v42 = vmax.f32 %v793_v1, 0.0  ;;  %v2087_v1 = vld [vmem:[%s4009_s5 + $0xb0] sm:$0xff] }
  0xe2   :  { %4014 = vst [vmem:[#allocation6_spill] sm:$0xff] %v3562_v10  ;;  %2194 = vperm.xlu1 %2806, %v2084_v49   ;;  %2189 = vperm.xlu0 %2805, %v2083_v50   ;;  %v787_v14 = vpop.f32.mrb[3].mxu0  ;;  %v915_v39 = vpop.f32.mrb[3].mxu1  ;;  %v1073_v49 = vmax.f32 %v921_v2, 0.0  ;;  %v1039_v58 = vmax.f32 %v785_v18, 0.0  ;;  %v1071_v23 = vmax.f32 %v913_v9, 0.0 }
  0xe3   :  { %v788_v40 = vadd.f32 %v787_v14, %v3325_v44  ;;  %v916_v41 = vadd.f32 %v915_v39, %v3405_v12  ;;  %v1042_v50 = vmax.f32 %v796_v31, 0.0  ;;  %v1074_v43 = vmax.f32 %v924_v32, 0.0  ;;  %v2088_v14 = vld [vmem:[%s4009_s5 + $0xb8] sm:$0xff] }
  0xe5   :  { %v3577_v57 = vpop.permute.xlu1 %227  ;;  %v3579_v26 = vpop.permute.xlu0 %307  ;;  %v1040_v24 = vmax.f32 %v788_v40, 0.0  ;;  %v1072_v10 = vmax.f32 %v916_v41, 0.0  ;;  %v3581_v6 = vpack.c.bf16 %v1042_v50, %v1041_v42  ;;  %v3583_v36 = vpack.c.bf16 %v1074_v43, %v1073_v49 }
  0xe6   :  { %4015 = vst [vmem:[#allocation7_spill] sm:$0xff] %v3579_v26  ;;  %2204 = vperm.xlu1 %2806, %v2086_v7   ;;  %2199 = vperm.xlu0 %2805, %v2085_v21   ;;  %v2740_v44 = vpop.f32.mrb[4].mxu0  ;;  %v2772_v12 = vpop.f32.mrb[4].mxu1  ;;  %v2326_v26 = vld [vmem:[#allocation2] sm:$0x1] }
  0xe7   :  { %v3591_v2 = vpack.c.bf16 %v1040_v24, %v1039_v58  ;;  %v3593_v9 = vpack.c.bf16 %v1072_v10, %v1071_v23  ;;  %v800_v18 = vpop.f32.mrb[5].mxu0  ;;  %v928_v31 = vpop.f32.mrb[5].mxu1  ;;  %v809_v32 = vadd.f32 %v2740_v44, %v3345_v52  ;;  %v937_v39 = vadd.f32 %v2772_v12, %v3489_v53  ;;  %v2090_v53 = vld [vmem:[%s4009_s5 + $0xc8] sm:$0xff] }
  0xe8   :  { %v801_v40 = vadd.f32 %v800_v18, %v3335_v48  ;;  %v929_v41 = vadd.f32 %v928_v31, %v3459_v33  ;;  %v2741_v42 = vpop.f32.mrb[6].mxu0  ;;  %v2773_v49 = vpop.f32.mrb[6].mxu1  ;;  %v2089_v48 = vld [vmem:[%s4009_s5 + $0xc0] sm:$0xff] }
  0xe9   :  { %v3597_v7 = vpop.permute.xlu1 %467  ;;  %v3599_v21 = vpop.permute.xlu0 %462  ;;  %v812_v10 = vadd.f32 %v2741_v42, %v3343_v51  ;;  %v940_v50 = vadd.f32 %v2773_v49, %v3501_v62  ;;  %v1045_v23 = vmax.f32 %v809_v32, 0.0  ;;  %v1077_v24 = vmax.f32 %v937_v39, 0.0  ;;  %v2091_v32 = vld [vmem:[%s4009_s5 + $0xd0] sm:$0xff] }
  0xea   :  { %4016 = vst [vmem:[#allocation8_spill] sm:$0xff] %v3597_v7  ;;  %2214 = vperm.xlu1 %2806, %v2088_v14   ;;  %2209 = vperm.xlu0 %2805, %v2087_v1   ;;  %v803_v43 = vpop.f32.mrb[7].mxu0  ;;  %v931_v52 = vpop.f32.mrb[7].mxu1  ;;  %v1043_v14 = vmax.f32 %v801_v40, 0.0  ;;  %v1075_v1 = vmax.f32 %v929_v41, 0.0 }
  0xeb   :  { %v804_v33 = vadd.f32 %v803_v43, %v3333_v47  ;;  %v932_v58 = vadd.f32 %v931_v52, %v3471_v38  ;;  %v1046_v44 = vmax.f32 %v812_v10, 0.0  ;;  %v1078_v51 = vmax.f32 %v940_v50, 0.0  ;;  %v1229_v38 = vld [vmem:[%s4007_s4 + $0xf0] sm:$0xff] }
  0xed   :  { %v3613_v12 = vpop.permute.xlu1 %387  ;;  %v383_v62 = vpop.permute.xlu0 %382  ;;  %v1044_v18 = vmax.f32 %v804_v33, 0.0  ;;  %v1076_v31 = vmax.f32 %v932_v58, 0.0  ;;  %v3615_v42 = vpack.c.bf16 %v1046_v44, %v1045_v23  ;;  %v3617_v49 = vpack.c.bf16 %v1078_v51, %v1077_v24 }
  0xee   :  { %2224 = vperm.xlu1 %2806, %v2090_v53   ;;  %2219 = vperm.xlu0 %2805, %v2089_v48   ;;  %v2744_v47 = vpop.f32.mrb[8].mxu0  ;;  %v2776_v43 = vpop.f32.mrb[8].mxu1 }
  0xef   :  { %v3625_v39 = vpack.c.bf16 %v1044_v18, %v1043_v14  ;;  %v3627_v40 = vpack.c.bf16 %v1076_v31, %v1075_v1  ;;  %v816_v41 = vpop.f32.mrb[9].mxu0  ;;  %v944_v10 = vpop.f32.mrb[9].mxu1  ;;  %v825_v50 = vadd.f32 %v2744_v47, %v3365_v60  ;;  %v953_v52 = vadd.f32 %v2776_v43, %v3549_v35  ;;  %v1230_v35 = vld [vmem:[%s4007_s4 + $0xf8] sm:$0xff] }
  0xf0   :  { %v817_v33 = vadd.f32 %v816_v41, %v3355_v56  ;;  %v945_v58 = vadd.f32 %v944_v10, %v3519_v13  ;;  %v2745_v23 = vpop.f32.mrb[10].mxu0  ;;  %v2777_v24 = vpop.f32.mrb[10].mxu1  ;;  %v2092_v56 = vld [vmem:[%s4009_s5 + $0xd8] sm:$0xff] }
  0xf1   :  { %v3631_v53 = vpop.permute.xlu1 %317  ;;  %v3633_v48 = vpop.permute.xlu0 %312  ;;  %v828_v44 = vadd.f32 %v2745_v23, %v3363_v59  ;;  %v956_v51 = vadd.f32 %v2777_v24, %v3564_v17  ;;  %v1049_v18 = vmax.f32 %v825_v50, 0.0  ;;  %v1081_v31 = vmax.f32 %v953_v52, 0.0  ;;  %v2093_v50 = vld [vmem:[%s4009_s5 + $0xe0] sm:$0xff] }
  0xf2   :  { %1383 = vperm.xlu1 %2806, %v1229_v38   ;;  %2229 = vperm.xlu0 %2805, %v2091_v32   ;;  %v819_v14 = vpop.f32.mrb[11].mxu0  ;;  %v947_v60 = vpop.f32.mrb[11].mxu1  ;;  %v1047_v38 = vmax.f32 %v817_v33, 0.0  ;;  %v1079_v32 = vmax.f32 %v945_v58, 0.0 }
  0xf3   :  { %v820_v13 = vadd.f32 %v819_v14, %v3353_v55  ;;  %v948_v1 = vadd.f32 %v947_v60, %v3531_v20  ;;  %v1050_v47 = vmax.f32 %v828_v44, 0.0  ;;  %v1082_v59 = vmax.f32 %v956_v51, 0.0  ;;  %v2094_v20 = vld [vmem:[%s4009_s5 + $0xe8] sm:$0xff] }
  0xf5   :  { %v238_v43 = vpop.permute.xlu1 %237  ;;  %v233_v17 = vpop.permute.xlu0 %232  ;;  %v1048_v41 = vmax.f32 %v820_v13, 0.0  ;;  %v1080_v10 = vmax.f32 %v948_v1, 0.0  ;;  %v3647_v23 = vpack.c.bf16 %v1050_v47, %v1049_v18  ;;  %v3649_v24 = vpack.c.bf16 %v1082_v59, %v1081_v31  ;;  %v2096_v59 = vld [vmem:[%s4009_s5 + $0xf8] sm:$0xff] }
  0xf6   :  { %1388 = vperm.xlu1 %2806, %v1230_v35   ;;  %2234 = vperm.xlu0 %2805, %v2092_v56   ;;  %v2748_v7 = vpop.f32.mrb[12].mxu0  ;;  %v2780_v55 = vpop.f32.mrb[12].mxu1 }
  0xf7   :  { %4017 = vst [vmem:[#allocation9_spill] sm:$0xff] %v3647_v23  ;;  %4018 = vst [vmem:[#allocation10_spill] sm:$0xff] %v3649_v24  ;;  %v3657_v52 = vpack.c.bf16 %v1048_v41, %v1047_v38  ;;  %v3659_v33 = vpack.c.bf16 %v1080_v10, %v1079_v32  ;;  %v832_v58 = vpop.f32.mrb[13].mxu0  ;;  %v960_v44 = vpop.f32.mrb[13].mxu1  ;;  %v841_v51 = vadd.f32 %v2748_v7, %v233_v17 }
  0xf8   :  { %v833_v14 = vadd.f32 %v832_v58, %v3375_v0  ;;  %v961_v60 = vadd.f32 %v960_v44, %v383_v62  ;;  %v2749_v13 = vpop.f32.mrb[14].mxu0  ;;  %v2781_v1 = vpop.f32.mrb[14].mxu1  ;;  %v2095_v0 = vld [vmem:[%s4009_s5 + $0xf0] sm:$0xff] }
  0xf9   :  { %v3662_v35 = vpop.permute.xlu1 %477  ;;  %v3664_v56 = vpop.permute.xlu0 %472  ;;  %v844_v18 = vadd.f32 %v2749_v13, %v238_v43  ;;  %v1053_v17 = vmax.f32 %v841_v51, 0.0 }
  0xfa   :  { %2244 = vperm.xlu1 %2806, %v2094_v20   ;;  %2239 = vperm.xlu0 %2805, %v2093_v50   ;;  %v835_v31 = vpop.f32.mrb[15].mxu0  ;;  %v963_v47 = vpop.f32.mrb[15].mxu1  ;;  %v1051_v38 = vmax.f32 %v833_v14, 0.0  ;;  %v1083_v32 = vmax.f32 %v961_v60, 0.0 }
  0xfb   :  { %v836_v7 = vadd.f32 %v835_v31, %v3577_v57  ;;  %v964_v62 = vadd.f32 %v963_v47, %v3613_v12  ;;  %v1054_v41 = vmax.f32 %v844_v18, 0.0 }
  0xfd   :  { %v398_v10 = vpop.permute.xlu1 %397  ;;  %v393_v43 = vpop.permute.xlu0 %392  ;;  %v1052_v20 = vmax.f32 %v836_v7, 0.0  ;;  %v1084_v50 = vmax.f32 %v964_v62, 0.0  ;;  %v3674_v13 = vpack.c.bf16 %v1054_v41, %v1053_v17 }
  0xfe   :  { %v972_v58 = vadd.f32 %v2781_v1, %v398_v10  ;;  %v969_v44 = vadd.f32 %v2780_v55, %v393_v43  ;;  %2254 = vperm.xlu1 %2806, %v2096_v59   ;;  %2249 = vperm.xlu0 %2805, %v2095_v0   ;;  %v2752_v24 = vpop.f32.mrb[16].mxu0  ;;  %v2784_v23 = vpop.f32.mrb[16].mxu1 }
  0xff   :  { %v3676_v57 = vpack.c.bf16 %v1052_v20, %v1051_v38  ;;  %v3678_v12 = vpack.c.bf16 %v1084_v50, %v1083_v32  ;;  %v848_v60 = vpop.f32.mrb[17].mxu0  ;;  %v976_v18 = vpop.f32.mrb[17].mxu1  ;;  %v857_v31 = vadd.f32 %v2752_v24, %v3403_v11  ;;  %v985_v1 = vadd.f32 %v2784_v23, %v3413_v15 }
 0x100   :  { %v1086_v51 = vmax.f32 %v972_v58, 0.0  ;;  %v1085_v14 = vmax.f32 %v969_v44, 0.0  ;;  %v849_v55 = vadd.f32 %v848_v60, %v3373_v63  ;;  %v977_v47 = vadd.f32 %v976_v18, %v3383_v3  ;;  %v2753_v0 = vpop.f32.mrb[18].mxu0  ;;  %v2785_v7 = vpop.f32.mrb[18].mxu1 }
 0x101   :  { %v851_v62 = vpop.f32.mrb[19].mxu0  ;;  %v979_v17 = vpop.f32.mrb[19].mxu1  ;;  %v860_v38 = vadd.f32 %v2753_v0, %v3415_v16  ;;  %v988_v32 = vadd.f32 %v2785_v7, %v3431_v22  ;;  %v1057_v15 = vmax.f32 %v857_v31, 0.0  ;;  %v1089_v23 = vmax.f32 %v985_v1, 0.0 }
 0x102   :  { %v3684_v59 = vpack.c.bf16 %v1086_v51, %v1085_v14  ;;  %2329 = vperm.xlu0 %2805, %v2326_v26   ;;  %v852_v41 = vadd.f32 %v851_v62, %v3385_v4  ;;  %v980_v11 = vadd.f32 %v979_v17, %v3395_v8  ;;  %v1055_v63 = vmax.f32 %v849_v55, 0.0 }
 0x103   :  { %v1087_v24 = vmax.f32 %v977_v47, 0.0  ;;  %v1058_v3 = vmax.f32 %v860_v38, 0.0  ;;  %v1090_v10 = vmax.f32 %v988_v32, 0.0 }
 0x104   :  { %v1056_v43 = vmax.f32 %v852_v41, 0.0  ;;  %v1088_v20 = vmax.f32 %v980_v11, 0.0 }
 0x105   :  { %v1176_v58 = vpack.c.bf16 %v1058_v3, %v1057_v15  ;;  %v1192_v44 = vpack.c.bf16 %v1090_v10, %v1089_v23 }
 0x106   :  { %v2756_v50 = vpop.f32.mrb[20].mxu0  ;;  %v2788_v26 = vpop.f32.mrb[20].mxu1  ;;  %v1175_v51 = vpack.c.bf16 %v1056_v43, %v1055_v63  ;;  %v1191_v16 = vpack.c.bf16 %v1088_v20, %v1087_v24 }
 0x107   :  { %v864_v14 = vpop.f32.mrb[21].mxu0  ;;  %v992_v22 = vpop.f32.mrb[21].mxu1  ;;  %v873_v4 = vadd.f32 %v2756_v50, %v3469_v37  ;;  %v1001_v8 = vadd.f32 %v2788_v26, %v3479_v45  ;;  %v4019_v26 = vld [vmem:[#allocation5_spill] sm:$0xff] }
 0x108   :  { %v865_v60 = vadd.f32 %v864_v14, %v3439_v25  ;;  %v993_v18 = vadd.f32 %v992_v22, %v3449_v29  ;;  %v2757_v31 = vpop.f32.mrb[22].mxu0  ;;  %v2789_v1 = vpop.f32.mrb[22].mxu1  ;;  %2506 = vmatprep.subr.bf16.mxu1 %v1175_v51  ;;  %2618 = vmatprep.subr.bf16.mxu0 %v1191_v16 }
 0x109   :  { %v867_v55 = vpop.f32.mrb[23].mxu0  ;;  %v995_v47 = vpop.f32.mrb[23].mxu1  ;;  %2507 = vmatpush3.bf16.msra.mxu1 %v3591_v2  ;;  %2619 = vmatpush3.bf16.msra.mxu0 %v3593_v9  ;;  %v876_v0 = vadd.f32 %v2757_v31, %v3481_v46  ;;  %v1004_v37 = vadd.f32 %v2789_v1, %v3491_v54  ;;  %v1061_v29 = vmax.f32 %v873_v4, 0.0  ;;  %v1093_v7 = vmax.f32 %v1001_v8, 0.0 }
 0x10a   :  { %v868_v45 = vadd.f32 %v867_v55, %v3451_v30  ;;  %v996_v25 = vadd.f32 %v995_v47, %v3461_v34  ;;  %2508 = vmatprep.subr.bf16.mxu1 %v1176_v58  ;;  %v1059_v62 = vmax.f32 %v865_v60, 0.0  ;;  %v1091_v17 = vmax.f32 %v993_v18, 0.0  ;;  %2620 = vmatprep.subr.bf16.mxu0 %v1192_v44  ;;  %v4020_v58 = vld [vmem:[#allocation3_spill] sm:$0xff]  ;;  %v4021_v44 = vld [vmem:[#allocation4_spill] sm:$0xff] }
 0x10b   :  { %v1062_v38 = vmax.f32 %v876_v0, 0.0  ;;  %v1094_v32 = vmax.f32 %v1004_v37, 0.0 }
 0x10c   :  { %v1060_v41 = vmax.f32 %v868_v45, 0.0  ;;  %v1092_v2 = vmax.f32 %v996_v25, 0.0  ;;  %v4022_v45 = vld [vmem:[#allocation6_spill] sm:$0xff] }
 0x10d   :  { %2509 = vmatpush3.bf16.msra.mxu1 %v3581_v6  ;;  %2621 = vmatpush3.bf16.msra.mxu0 %v3583_v36  ;;  %v1178_v9 = vpack.c.bf16 %v1062_v38, %v1061_v29  ;;  %v1194_v30 = vpack.c.bf16 %v1094_v32, %v1093_v7  ;;  %v4023_v38 = vld [vmem:[#allocation7_spill] sm:$0xff]  ;;  %v4024_v32 = vld [vmem:[#allocation8_spill] sm:$0xff] }
 0x10e   :  { %v2760_v46 = vpop.f32.mrb[24].mxu0  ;;  %v2792_v54 = vpop.f32.mrb[24].mxu1  ;;  %v1177_v11 = vpack.c.bf16 %v1060_v41, %v1059_v62  ;;  %v1193_v34 = vpack.c.bf16 %v1092_v2, %v1091_v17 }
 0x10f   :  { %v880_v15 = vpop.f32.mrb[25].mxu0  ;;  %v1008_v23 = vpop.f32.mrb[25].mxu1  ;;  %v889_v63 = vadd.f32 %v2760_v46, %v3529_v19  ;;  %v1017_v24 = vadd.f32 %v2792_v54, %v3539_v27 }
 0x110   :  { %v881_v3 = vadd.f32 %v880_v15, %v3499_v61  ;;  %v1009_v10 = vadd.f32 %v1008_v23, %v3509_v5  ;;  %v2761_v43 = vpop.f32.mrb[26].mxu0  ;;  %v2793_v6 = vpop.f32.mrb[26].mxu1  ;;  %2510 = vmatprep.subr.bf16.mxu1 %v1177_v11  ;;  %2622 = vmatprep.subr.bf16.mxu0 %v1193_v34  ;;  %v4025_v34 = vld [vmem:[#allocation9_spill] sm:$0xff] }
 0x111   :  { %v883_v36 = vpop.f32.mrb[27].mxu0  ;;  %v1011_v20 = vpop.f32.mrb[27].mxu1  ;;  %2511 = vmatpush3.bf16.msra.mxu1 %v3625_v39  ;;  %2623 = vmatpush3.bf16.msra.mxu0 %v3627_v40  ;;  %v892_v50 = vadd.f32 %v2761_v43, %v3541_v28  ;;  %v1020_v19 = vadd.f32 %v2793_v6, %v4019_v26  ;;  %v1065_v5 = vmax.f32 %v889_v63, 0.0  ;;  %v1097_v51 = vmax.f32 %v1017_v24, 0.0  ;;  %v2841_v63 = vld [vmem:[%s4008_s3] ss:$16 sps:$4 sm:$0xff]  }
 0x112   :  { %v884_v27 = vadd.f32 %v883_v36, %v4020_v58  ;;  %v1012_v61 = vadd.f32 %v1011_v20, %v4021_v44  ;;  %2512 = vmatprep.subr.bf16.mxu1 %v1178_v9  ;;  %v1063_v16 = vmax.f32 %v881_v3, 0.0  ;;  %v1095_v14 = vmax.f32 %v1009_v10, 0.0  ;;  %2624 = vmatprep.subr.bf16.mxu0 %v1194_v30  ;;  %v2844_v24 = vld [vmem:[%s4008_s3 + $0x8] ss:$16 sps:$4 sm:$0xff]   ;;  %v2849_v3 = vld [vmem:[%s4008_s3 + $0x20] ss:$16 sps:$4 sm:$0xff]  }
 0x113   :  { %v1066_v22 = vmax.f32 %v892_v50, 0.0  ;;  %v1098_v4 = vmax.f32 %v1020_v19, 0.0  ;;  %v2856_v10 = vld [vmem:[%s4008_s3 + $0x4c] ss:$16 sps:$4 sm:$0xff]   ;;  %v2855_v43 = vld [vmem:[%s4008_s3 + $0x40] ss:$16 sps:$4 sm:$0xff]  }
 0x114   :  { %v1064_v8 = vmax.f32 %v884_v27, 0.0  ;;  %v1096_v39 = vmax.f32 %v1012_v61, 0.0  ;;  %v2858_v6 = vld [vmem:[%s4008_s3 + $0x48] ss:$16 sps:$4 sm:$0xff]   ;;  %v2859_v36 = vld [vmem:[%s4008_s3 + $0x64] ss:$16 sps:$4 sm:$0xff]  }
 0x115   :  { %2513 = vmatpush3.bf16.msra.mxu1 %v3615_v42  ;;  %2625 = vmatpush3.bf16.msra.mxu0 %v3617_v49  ;;  %v1180_v60 = vpack.c.bf16 %v1066_v22, %v1065_v5  ;;  %v1196_v18 = vpack.c.bf16 %v1098_v4, %v1097_v51  ;;  %v2862_v20 = vld [vmem:[%s4008_s3 + $0x6c] ss:$16 sps:$4 sm:$0xff]   ;;  %v2861_v50 = vld [vmem:[%s4008_s3 + $0x60] ss:$16 sps:$4 sm:$0xff]   ;;  %v2864_v26 = vld [vmem:[%s4008_s3 + $0x68] ss:$16 sps:$4 sm:$0xff]  }
 0x116   :  { %v2764_v28 = vpop.f32.mrb[28].mxu0  ;;  %v2796_v40 = vpop.f32.mrb[28].mxu1  ;;  %v1179_v31 = vpack.c.bf16 %v1064_v8, %v1063_v16  ;;  %v1195_v1 = vpack.c.bf16 %v1096_v39, %v1095_v14  ;;  %v2865_v19 = vld [vmem:[%s4008_s3 + $0x84] ss:$16 sps:$4 sm:$0xff]   ;;  %v2868_v58 = vld [vmem:[%s4008_s3 + $0x8c] ss:$16 sps:$4 sm:$0xff]  }
 0x117   :  { %v896_v55 = vpop.f32.mrb[29].mxu0  ;;  %v1024_v47 = vpop.f32.mrb[29].mxu1  ;;  %v905_v0 = vadd.f32 %v2764_v28, %v3633_v48  ;;  %v1033_v37 = vadd.f32 %v2796_v40, %v3664_v56  ;;  %v2867_v27 = vld [vmem:[%s4008_s3 + $0x80] ss:$16 sps:$4 sm:$0xff]   ;;  %v2870_v44 = vld [vmem:[%s4008_s3 + $0x88] ss:$16 sps:$4 sm:$0xff]  }
 0x118   :  { %v897_v25 = vadd.f32 %v896_v55, %v4022_v45  ;;  %v1025_v29 = vadd.f32 %v1024_v47, %v3599_v21  ;;  %v2765_v7 = vpop.f32.mrb[30].mxu0  ;;  %v2797_v42 = vpop.f32.mrb[30].mxu1  ;;  %2514 = vmatprep.subr.bf16.mxu1 %v1179_v31  ;;  %2626 = vmatprep.subr.bf16.mxu0 %v1195_v1  ;;  %v2871_v61 = vld [vmem:[%s4008_s3 + $0xa4] ss:$16 sps:$4 sm:$0xff]   ;;  %v2874_v5 = vld [vmem:[%s4008_s3 + $0xac] ss:$16 sps:$4 sm:$0xff]  }
 0x119   :  { %v899_v49 = vpop.f32.mrb[31].mxu0  ;;  %v1027_v62 = vpop.f32.mrb[31].mxu1  ;;  %2515 = vmatpush3.bf16.msra.mxu1 %v3657_v52  ;;  %2627 = vmatpush3.bf16.msra.mxu0 %v3659_v33  ;;  %v908_v17 = vadd.f32 %v2765_v7, %v3631_v53  ;;  %v1036_v48 = vadd.f32 %v2797_v42, %v3662_v35  ;;  %v1069_v21 = vmax.f32 %v905_v0, 0.0  ;;  %v1101_v2 = vmax.f32 %v1033_v37, 0.0  ;;  %v4026_v33 = vld [vmem:[#allocation10_spill] sm:$0xff] }
 0x11a   :  { %v900_v56 = vadd.f32 %v899_v49, %v4023_v38  ;;  %v1028_v41 = vadd.f32 %v1027_v62, %v4024_v32  ;;  %2516 = vmatprep.subr.bf16.mxu1 %v1180_v60  ;;  %v1067_v46 = vmax.f32 %v897_v25, 0.0  ;;  %v1099_v54 = vmax.f32 %v1025_v29, 0.0  ;;  %2628 = vmatprep.subr.bf16.mxu0 %v1196_v18  ;;  %v2873_v51 = vld [vmem:[%s4008_s3 + $0xa0] ss:$16 sps:$4 sm:$0xff]   ;;  %v2876_v16 = vld [vmem:[%s4008_s3 + $0xa8] ss:$16 sps:$4 sm:$0xff]  }
 0x11b   :  { %v1070_v9 = vmax.f32 %v908_v17, 0.0  ;;  %v1102_v30 = vmax.f32 %v1036_v48, 0.0  ;;  %v2877_v14 = vld [vmem:[%s4008_s3 + $0xc4] ss:$16 sps:$4 sm:$0xff]   ;;  %v2880_v22 = vld [vmem:[%s4008_s3 + $0xcc] ss:$16 sps:$4 sm:$0xff]  }
 0x11c   :  { %v1068_v11 = vmax.f32 %v900_v56, 0.0  ;;  %v1100_v52 = vmax.f32 %v1028_v41, 0.0  ;;  %v2879_v4 = vld [vmem:[%s4008_s3 + $0xc0] ss:$16 sps:$4 sm:$0xff]   ;;  %v2882_v8 = vld [vmem:[%s4008_s3 + $0xc8] ss:$16 sps:$4 sm:$0xff]  }
 0x11d   :  { %2517 = vmatpush3.bf16.msra.mxu1 %v4025_v34  ;;  %2629 = vmatpush3.bf16.msra.mxu0 %v4026_v33  ;;  %v1182_v53 = vpack.c.bf16 %v1070_v9, %v1069_v21  ;;  %v1198_v35 = vpack.c.bf16 %v1102_v30, %v1101_v2  ;;  %v2883_v39 = vld [vmem:[%s4008_s3 + $0xe4] ss:$16 sps:$4 sm:$0xff]   ;;  %v2886_v28 = vld [vmem:[%s4008_s3 + $0xec] ss:$16 sps:$4 sm:$0xff]   ;;  %v2885_v40 = vld [vmem:[%s4008_s3 + $0xe0] ss:$16 sps:$4 sm:$0xff]  }
 0x11e   :  { %v1181_v15 = vpack.c.bf16 %v1068_v11, %v1067_v46  ;;  %v1197_v23 = vpack.c.bf16 %v1100_v52, %v1099_v54  ;;  %v2888_v60 = vld [vmem:[%s4008_s3 + $0xe8] ss:$16 sps:$4 sm:$0xff]   ;;  %v2889_v18 = vld [vmem:[%s4008_s3 + $0x104] ss:$16 sps:$4 sm:$0xff]   ;;  %v2892_v31 = vld [vmem:[%s4008_s3 + $0x10c] ss:$16 sps:$4 sm:$0xff]  }
 0x11f   :  { %v2891_v1 = vld [vmem:[%s4008_s3 + $0x100] ss:$16 sps:$4 sm:$0xff]   ;;  %v2894_v55 = vld [vmem:[%s4008_s3 + $0x108] ss:$16 sps:$4 sm:$0xff]   ;;  %v2895_v47 = vld [vmem:[%s4008_s3 + $0x124] ss:$16 sps:$4 sm:$0xff]  }
 0x120   :  { %2518 = vmatprep.subr.bf16.mxu1 %v1181_v15  ;;  %2630 = vmatprep.subr.bf16.mxu0 %v1197_v23  ;;  %v2898_v0 = vld [vmem:[%s4008_s3 + $0x12c] ss:$16 sps:$4 sm:$0xff]   ;;  %v2897_v37 = vld [vmem:[%s4008_s3 + $0x120] ss:$16 sps:$4 sm:$0xff]   ;;  %v2900_v45 = vld [vmem:[%s4008_s3 + $0x128] ss:$16 sps:$4 sm:$0xff]   ;;  %v1239_v15 = vpop.permute.xlu1 %1238  ;;  %v1234_v23 = vpop.permute.xlu0 %1233 }
 0x121   :  { %2519 = vmatpush3.bf16.msra.mxu1 %v3676_v57  ;;  %2631 = vmatpush3.bf16.msra.mxu0 %v3678_v12  ;;  %v2847_v57 = vld [vmem:[%s4008_s3 + $0x24] ss:$16 sps:$4 sm:$0xff]   ;;  %v2850_v12 = vld [vmem:[%s4008_s3 + $0x2c] ss:$16 sps:$4 sm:$0xff]   ;;  %v2903_v7 = vld [vmem:[%s4008_s3 + $0x140] ss:$16 sps:$4 sm:$0xff]  }
 0x122   :  { %2520 = vmatprep.subr.bf16.mxu1 %v1182_v53  ;;  %2632 = vmatprep.subr.bf16.mxu0 %v1198_v35  ;;  %v2901_v25 = vld [vmem:[%s4008_s3 + $0x144] ss:$16 sps:$4 sm:$0xff]   ;;  %v2904_v29 = vld [vmem:[%s4008_s3 + $0x14c] ss:$16 sps:$4 sm:$0xff]   ;;  %v2906_v42 = vld [vmem:[%s4008_s3 + $0x148] ss:$16 sps:$4 sm:$0xff]  }
 0x123   :  { %v2907_v49 = vld [vmem:[%s4008_s3 + $0x164] ss:$16 sps:$4 sm:$0xff]   ;;  %v2910_v62 = vld [vmem:[%s4008_s3 + $0x16c] ss:$16 sps:$4 sm:$0xff]   ;;  %v2909_v17 = vld [vmem:[%s4008_s3 + $0x160] ss:$16 sps:$4 sm:$0xff]  }
 0x124   :  { %v2912_v48 = vld [vmem:[%s4008_s3 + $0x168] ss:$16 sps:$4 sm:$0xff]   ;;  %v2913_v38 = vld [vmem:[%s4008_s3 + $0x184] ss:$16 sps:$4 sm:$0xff]   ;;  %v2916_v56 = vld [vmem:[%s4008_s3 + $0x18c] ss:$16 sps:$4 sm:$0xff]  }
 0x125   :  { %2521 = vmatpush3.bf16.msra.mxu1 %v3674_v13  ;;  %2633 = vmatpush3.bf16.msra.mxu0 %v3684_v59  ;;  %v2852_v13 = vld [vmem:[%s4008_s3 + $0x28] ss:$16 sps:$4 sm:$0xff]   ;;  %v2853_v59 = vld [vmem:[%s4008_s3 + $0x44] ss:$16 sps:$4 sm:$0xff]   ;;  %v2915_v32 = vld [vmem:[%s4008_s3 + $0x180] ss:$16 sps:$4 sm:$0xff]  }
 0x126   :  { %v2918_v41 = vld [vmem:[%s4008_s3 + $0x188] ss:$16 sps:$4 sm:$0xff]   ;;  %v2919_v21 = vld [vmem:[%s4008_s3 + $0x1a4] ss:$16 sps:$4 sm:$0xff]   ;;  %v2922_v2 = vld [vmem:[%s4008_s3 + $0x1ac] ss:$16 sps:$4 sm:$0xff]  }
 0x127   :  { %v2921_v46 = vld [vmem:[%s4008_s3 + $0x1a0] ss:$16 sps:$4 sm:$0xff]   ;;  %v2924_v54 = vld [vmem:[%s4008_s3 + $0x1a8] ss:$16 sps:$4 sm:$0xff]   ;;  %v2925_v9 = vld [vmem:[%s4008_s3 + $0x1c4] ss:$16 sps:$4 sm:$0xff]  }
 0x128   :  { %1744 = vmatmul.mubr.bf16.vlgmr.msra.gmra.mrb[32].mxu1 %v2841_v63  ;;  %1905 = vmatmul.mubr.bf16.vlgmr.msra.gmra.mrb[32].mxu0 %v2844_v24  ;;  %v2928_v30 = vld [vmem:[%s4008_s3 + $0x1cc] ss:$16 sps:$4 sm:$0xff]   ;;  %v2927_v11 = vld [vmem:[%s4008_s3 + $0x1c0] ss:$16 sps:$4 sm:$0xff]   ;;  %v2930_v52 = vld [vmem:[%s4008_s3 + $0x1c8] ss:$16 sps:$4 sm:$0xff]   ;;  %v3916_v63 = vpop.permute.xlu1 %1248  ;;  %v1244_v24 = vpop.permute.xlu0 %1243 }
 0x129   :  { %1751 = vmatprep.mubr.bf16.mxu1 %v2847_v57  ;;  %1912 = vmatprep.mubr.bf16.mxu0 %v2850_v12  ;;  %v2931_v34 = vld [vmem:[%s4008_s3 + $0x1e4] ss:$16 sps:$4 sm:$0xff]   ;;  %v2934_v33 = vld [vmem:[%s4008_s3 + $0x1ec] ss:$16 sps:$4 sm:$0xff]   ;;  %v2933_v53 = vld [vmem:[%s4008_s3 + $0x1e0] ss:$16 sps:$4 sm:$0xff]  }
 0x12a   :  { %v2936_v35 = vld [vmem:[%s4008_s3 + $0x1e8] ss:$16 sps:$4 sm:$0xff]  }
 0x12c   :  { %v3918_v57 = vpop.permute.xlu1 %1258  ;;  %v3920_v12 = vpop.permute.xlu0 %1253 }
 0x130   :  { %1752 = vmatmul.mubr.bf16.gmra.mrb[36].mxu1 %v2849_v3  ;;  %1913 = vmatmul.mubr.bf16.gmra.mrb[36].mxu0 %v2852_v13  ;;  %v3922_v3 = vpop.permute.xlu1 %1268  ;;  %v3924_v13 = vpop.permute.xlu0 %1263 }
 0x131   :  { %1759 = vmatprep.mubr.bf16.mxu1 %v2853_v59  ;;  %1920 = vmatprep.mubr.bf16.mxu0 %v2856_v10 }
 0x134   :  { %v3926_v59 = vpop.permute.xlu1 %1278  ;;  %v3928_v10 = vpop.permute.xlu0 %1273 }
 0x138   :  { %1760 = vmatmul.mubr.bf16.gmra.mrb[40].mxu1 %v2855_v43  ;;  %1921 = vmatmul.mubr.bf16.gmra.mrb[40].mxu0 %v2858_v6  ;;  %v3930_v43 = vpop.permute.xlu1 %1288  ;;  %v3932_v6 = vpop.permute.xlu0 %1283 }
 0x139   :  { %1767 = vmatprep.mubr.bf16.mxu1 %v2859_v36  ;;  %1928 = vmatprep.mubr.bf16.mxu0 %v2862_v20 }
 0x13c   :  { %v3934_v36 = vpop.permute.xlu1 %1298  ;;  %v3936_v20 = vpop.permute.xlu0 %1293 }
 0x140   :  { %1768 = vmatmul.mubr.bf16.gmra.mrb[44].mxu1 %v2861_v50  ;;  %1929 = vmatmul.mubr.bf16.gmra.mrb[44].mxu0 %v2864_v26  ;;  %v3938_v50 = vpop.permute.xlu1 %1308  ;;  %v3940_v26 = vpop.permute.xlu0 %1303 }
 0x141   :  { %1775 = vmatprep.mubr.bf16.mxu1 %v2865_v19  ;;  %1936 = vmatprep.mubr.bf16.mxu0 %v2868_v58 }
 0x144   :  { %v3942_v19 = vpop.permute.xlu1 %1318  ;;  %v3944_v58 = vpop.permute.xlu0 %1313 }
 0x148   :  { %1776 = vmatmul.mubr.bf16.gmra.mrb[48].mxu1 %v2867_v27  ;;  %1937 = vmatmul.mubr.bf16.gmra.mrb[48].mxu0 %v2870_v44  ;;  %v3946_v27 = vpop.permute.xlu1 %1328  ;;  %v3948_v44 = vpop.permute.xlu0 %1323 }
 0x149   :  { %1783 = vmatprep.mubr.bf16.mxu1 %v2871_v61  ;;  %1944 = vmatprep.mubr.bf16.mxu0 %v2874_v5 }
 0x14c   :  { %v3950_v61 = vpop.permute.xlu1 %1338  ;;  %v3952_v5 = vpop.permute.xlu0 %1333 }
 0x150   :  { %1784 = vmatmul.mubr.bf16.gmra.mrb[52].mxu1 %v2873_v51  ;;  %1945 = vmatmul.mubr.bf16.gmra.mrb[52].mxu0 %v2876_v16  ;;  %v3954_v51 = vpop.permute.xlu1 %1348  ;;  %v3956_v16 = vpop.permute.xlu0 %1343 }
 0x151   :  { %1791 = vmatprep.mubr.bf16.mxu1 %v2877_v14  ;;  %1952 = vmatprep.mubr.bf16.mxu0 %v2880_v22 }
 0x154   :  { %v3958_v14 = vpop.permute.xlu1 %1358  ;;  %v3960_v22 = vpop.permute.xlu0 %1353 }
 0x158   :  { %1792 = vmatmul.mubr.bf16.gmra.mrb[56].mxu1 %v2879_v4  ;;  %1953 = vmatmul.mubr.bf16.gmra.mrb[56].mxu0 %v2882_v8  ;;  %v3962_v4 = vpop.permute.xlu1 %1368  ;;  %v3964_v8 = vpop.permute.xlu0 %1363 }
 0x159   :  { %1799 = vmatprep.mubr.bf16.mxu1 %v2883_v39  ;;  %1960 = vmatprep.mubr.bf16.mxu0 %v2886_v28 }
 0x15c   :  { %v3966_v39 = vpop.permute.xlu1 %1378  ;;  %v3968_v28 = vpop.permute.xlu0 %1373 }
 0x160   :  { %1800 = vmatmul.mubr.bf16.gmra.mrb[60].mxu1 %v2885_v40  ;;  %1961 = vmatmul.mubr.bf16.gmra.mrb[60].mxu0 %v2888_v60  ;;  %v2105_v40 = vpop.permute.xlu1 %2104  ;;  %v2100_v60 = vpop.permute.xlu0 %2099 }
 0x161   :  { %1807 = vmatprep.mubr.bf16.mxu1 %v2889_v18  ;;  %1968 = vmatprep.mubr.bf16.mxu0 %v2892_v31 }
 0x168   :  { %1808 = vmatmul.mubr.bf16.gmra.mrb[64].mxu1 %v2891_v1  ;;  %1969 = vmatmul.mubr.bf16.gmra.mrb[64].mxu0 %v2894_v55 }
 0x169   :  { %1815 = vmatprep.mubr.bf16.mxu1 %v2895_v47  ;;  %1976 = vmatprep.mubr.bf16.mxu0 %v2898_v0 }
 0x170   :  { %1816 = vmatmul.mubr.bf16.gmra.mrb[68].mxu1 %v2897_v37  ;;  %1977 = vmatmul.mubr.bf16.gmra.mrb[68].mxu0 %v2900_v45 }
 0x171   :  { %1823 = vmatprep.mubr.bf16.mxu1 %v2901_v25  ;;  %1984 = vmatprep.mubr.bf16.mxu0 %v2904_v29 }
 0x178   :  { %1824 = vmatmul.mubr.bf16.gmra.mrb[72].mxu1 %v2903_v7  ;;  %1985 = vmatmul.mubr.bf16.gmra.mrb[72].mxu0 %v2906_v42 }
 0x179   :  { %1831 = vmatprep.mubr.bf16.mxu1 %v2907_v49  ;;  %1992 = vmatprep.mubr.bf16.mxu0 %v2910_v62 }
 0x180   :  { %1832 = vmatmul.mubr.bf16.gmra.mrb[76].mxu1 %v2909_v17  ;;  %1993 = vmatmul.mubr.bf16.gmra.mrb[76].mxu0 %v2912_v48  ;;  %v2115_v48 = vpop.permute.xlu1 %2114 }
 0x181   :  { %1839 = vmatprep.mubr.bf16.mxu1 %v2913_v38  ;;  %2000 = vmatprep.mubr.bf16.mxu0 %v2916_v56  ;;  %v2110_v38 = vpop.permute.xlu0 %2109 }
 0x188   :  { %1840 = vmatmul.mubr.bf16.gmra.mrb[80].mxu1 %v2915_v32  ;;  %2001 = vmatmul.mubr.bf16.gmra.mrb[80].mxu0 %v2918_v41 }
 0x189   :  { %1847 = vmatprep.mubr.bf16.mxu1 %v2919_v21  ;;  %2008 = vmatprep.mubr.bf16.mxu0 %v2922_v2 }
 0x190   :  { %1848 = vmatmul.mubr.bf16.gmra.mrb[84].mxu1 %v2921_v46  ;;  %2009 = vmatmul.mubr.bf16.gmra.mrb[84].mxu0 %v2924_v54 }
 0x191   :  { %1855 = vmatprep.mubr.bf16.mxu1 %v2925_v9  ;;  %2016 = vmatprep.mubr.bf16.mxu0 %v2928_v30 }
 0x198   :  { %1856 = vmatmul.mubr.bf16.gmra.mrb[88].mxu1 %v2927_v11  ;;  %2017 = vmatmul.mubr.bf16.gmra.mrb[88].mxu0 %v2930_v52 }
 0x199   :  { %1863 = vmatprep.mubr.bf16.mxu1 %v2931_v34  ;;  %2024 = vmatprep.mubr.bf16.mxu0 %v2934_v33 }
 0x1a0   :  { %1864 = vmatmul.mubr.bf16.gmra.mrb[92].mxu1 %v2933_v53  ;;  %2025 = vmatmul.mubr.bf16.gmra.mrb[92].mxu0 %v2936_v35 }
 0x1fb   :  { %v2522_v18 = vpop.f32.mrb[32].mxu1  ;;  %v2634_v31 = vpop.f32.mrb[32].mxu0 }
 0x1fc   :  { %v2523_v1 = vpop.f32.mrb[33].mxu1  ;;  %v2635_v55 = vpop.f32.mrb[33].mxu0 }
 0x1fd   :  { %v2524_v47 = vadd.f32 %v2523_v1, %v2522_v18  ;;  %v2525_v0 = vpop.f32.mrb[34].mxu1  ;;  %v2636_v37 = vadd.f32 %v2635_v55, %v2634_v31  ;;  %v2637_v45 = vpop.f32.mrb[34].mxu0 }
 0x1fe   :  { %v2526_v25 = vpop.f32.mrb[35].mxu1  ;;  %v2638_v29 = vpop.f32.mrb[35].mxu0 }
 0x1ff   :  { %v1746_v7 = vadd.f32 %v2524_v47, %v1234_v23  ;;  %v2527_v42 = vadd.f32 %v2526_v25, %v2525_v0  ;;  %v2639_v49 = vadd.f32 %v2638_v29, %v2637_v45  ;;  %v2125_v47 = vpop.permute.xlu1 %2124  ;;  %v2120_v0 = vpop.permute.xlu0 %2119 }
 0x201   :  { %v1749_v62 = vadd.f32 %v2527_v42, %v1239_v15  ;;  %v1907_v17 = vadd.f32 %v2636_v37, %v1746_v7 }
 0x203   :  { %v2033_v56 = vmax.f32 %v1907_v17, 0.0  ;;  %v1910_v32 = vadd.f32 %v2639_v49, %v1749_v62  ;;  %v2528_v41 = vpop.f32.mrb[36].mxu1  ;;  %v2640_v21 = vpop.f32.mrb[36].mxu0 }
 0x204   :  { %v2529_v2 = vpop.f32.mrb[37].mxu1  ;;  %v2641_v46 = vpop.f32.mrb[37].mxu0 }
 0x205   :  { %v2034_v54 = vmax.f32 %v1910_v32, 0.0  ;;  %v2530_v9 = vadd.f32 %v2529_v2, %v2528_v41  ;;  %v2531_v30 = vpop.f32.mrb[38].mxu1  ;;  %v2642_v11 = vadd.f32 %v2641_v46, %v2640_v21  ;;  %v2643_v52 = vpop.f32.mrb[38].mxu0  ;;  %v2257_v34 = vmul.f32 %v2100_v60, %v2033_v56 }
 0x206   :  { %v2532_v33 = vpop.f32.mrb[39].mxu1  ;;  %v2644_v53 = vpop.f32.mrb[39].mxu0 }
 0x207   :  { %v2258_v35 = vmul.f32 %v2105_v40, %v2034_v54  ;;  %v1754_v23 = vadd.f32 %v2530_v9, %v1244_v24  ;;  %v2533_v15 = vadd.f32 %v2532_v33, %v2531_v30  ;;  %v2645_v18 = vadd.f32 %v2644_v53, %v2643_v52  ;;  %v2130_v52 = vpop.permute.xlu0 %2129 }
 0x209   :  { %v2289_v31 = vadd.f32 %v2258_v35, %v2257_v34  ;;  %v1757_v1 = vadd.f32 %v2533_v15, %v3916_v63  ;;  %v1915_v55 = vadd.f32 %v2642_v11, %v1754_v23  ;;  %v2135_v11 = vpop.permute.xlu1 %2134 }
 0x20b   :  { %v2035_v37 = vmax.f32 %v1915_v55, 0.0  ;;  %v1918_v45 = vadd.f32 %v2645_v18, %v1757_v1  ;;  %v2534_v25 = vpop.f32.mrb[40].mxu1  ;;  %v2646_v29 = vpop.f32.mrb[40].mxu0 }
 0x20c   :  { %v2535_v7 = vpop.f32.mrb[41].mxu1  ;;  %v2647_v42 = vpop.f32.mrb[41].mxu0 }
 0x20d   :  { %v2259_v49 = vmul.f32 %v2110_v38, %v2035_v37  ;;  %v2036_v60 = vmax.f32 %v1918_v45, 0.0  ;;  %v2536_v62 = vadd.f32 %v2535_v7, %v2534_v25  ;;  %v2537_v17 = vpop.f32.mrb[42].mxu1  ;;  %v2648_v40 = vadd.f32 %v2647_v42, %v2646_v29  ;;  %v2649_v24 = vpop.f32.mrb[42].mxu0 }
 0x20e   :  { %v2538_v56 = vpop.f32.mrb[43].mxu1  ;;  %v2650_v32 = vpop.f32.mrb[43].mxu0 }
 0x20f   :  { %v2290_v41 = vadd.f32 %v2289_v31, %v2259_v49  ;;  %v2260_v21 = vmul.f32 %v2115_v48, %v2036_v60  ;;  %v1762_v63 = vadd.f32 %v2536_v62, %v3920_v12  ;;  %v2539_v2 = vadd.f32 %v2538_v56, %v2537_v17  ;;  %v2145_v62 = vpop.permute.xlu1 %2144  ;;  %v2140_v17 = vpop.permute.xlu0 %2139 }
 0x210   :  { %v2651_v46 = vadd.f32 %v2650_v32, %v2649_v24 }
 0x211   :  { %v2291_v54 = vadd.f32 %v2290_v41, %v2260_v21  ;;  %v1765_v9 = vadd.f32 %v2539_v2, %v3918_v57  ;;  %v1923_v30 = vadd.f32 %v2648_v40, %v1762_v63 }
 0x213   :  { %v2037_v38 = vmax.f32 %v1923_v30, 0.0  ;;  %v1926_v34 = vadd.f32 %v2651_v46, %v1765_v9  ;;  %v2540_v33 = vpop.f32.mrb[44].mxu1  ;;  %v2652_v53 = vpop.f32.mrb[44].mxu0 }
 0x214   :  { %v2541_v35 = vpop.f32.mrb[45].mxu1  ;;  %v2653_v23 = vpop.f32.mrb[45].mxu0 }
 0x215   :  { %v2261_v15 = vmul.f32 %v2120_v0, %v2037_v38  ;;  %v2038_v18 = vmax.f32 %v1926_v34, 0.0  ;;  %v2542_v31 = vadd.f32 %v2541_v35, %v2540_v33  ;;  %v2543_v48 = vpop.f32.mrb[46].mxu1  ;;  %v2654_v1 = vadd.f32 %v2653_v23, %v2652_v53  ;;  %v2655_v12 = vpop.f32.mrb[46].mxu0 }
 0x216   :  { %v2544_v55 = vpop.f32.mrb[47].mxu1  ;;  %v2656_v37 = vpop.f32.mrb[47].mxu0 }
 0x217   :  { %v2292_v45 = vadd.f32 %v2291_v54, %v2261_v15  ;;  %v2262_v25 = vmul.f32 %v2125_v47, %v2038_v18  ;;  %v1770_v57 = vadd.f32 %v2542_v31, %v3924_v13  ;;  %v2545_v29 = vadd.f32 %v2544_v55, %v2543_v48  ;;  %v2155_v15 = vpop.permute.xlu1 %2154  ;;  %v2150_v18 = vpop.permute.xlu0 %2149 }
 0x218   :  { %v2657_v7 = vadd.f32 %v2656_v37, %v2655_v12 }
 0x219   :  { %v2293_v42 = vadd.f32 %v2292_v45, %v2262_v25  ;;  %v1773_v49 = vadd.f32 %v2545_v29, %v3922_v3  ;;  %v1931_v60 = vadd.f32 %v2654_v1, %v1770_v57 }
 0x21b   :  { %v2039_v0 = vmax.f32 %v1931_v60, 0.0  ;;  %v1934_v40 = vadd.f32 %v2657_v7, %v1773_v49  ;;  %v2546_v24 = vpop.f32.mrb[48].mxu1  ;;  %v2658_v56 = vpop.f32.mrb[48].mxu0 }
 0x21c   :  { %v2547_v32 = vpop.f32.mrb[49].mxu1  ;;  %v2659_v41 = vpop.f32.mrb[49].mxu0 }
 0x21d   :  { %v2263_v21 = vmul.f32 %v2130_v52, %v2039_v0  ;;  %v2040_v63 = vmax.f32 %v1934_v40, 0.0  ;;  %v2548_v2 = vadd.f32 %v2547_v32, %v2546_v24  ;;  %v2549_v47 = vpop.f32.mrb[50].mxu1  ;;  %v2660_v46 = vadd.f32 %v2659_v41, %v2658_v56  ;;  %v2661_v13 = vpop.f32.mrb[50].mxu0 }
 0x21e   :  { %v2550_v54 = vpop.f32.mrb[51].mxu1  ;;  %v2662_v9 = vpop.f32.mrb[51].mxu0 }
 0x21f   :  { %v2294_v30 = vadd.f32 %v2293_v42, %v2263_v21  ;;  %v2264_v38 = vmul.f32 %v2135_v11, %v2040_v63  ;;  %v1778_v3 = vadd.f32 %v2548_v2, %v3928_v10  ;;  %v2551_v34 = vadd.f32 %v2550_v54, %v2549_v47  ;;  %v2165_v32 = vpop.permute.xlu1 %2164  ;;  %v2160_v41 = vpop.permute.xlu0 %2159 }
 0x220   :  { %v2663_v33 = vadd.f32 %v2662_v9, %v2661_v13 }
 0x221   :  { %v2295_v53 = vadd.f32 %v2294_v30, %v2264_v38  ;;  %v1781_v35 = vadd.f32 %v2551_v34, %v3926_v59  ;;  %v1939_v23 = vadd.f32 %v2660_v46, %v1778_v3 }
 0x223   :  { %v2041_v52 = vmax.f32 %v1939_v23, 0.0  ;;  %v1942_v31 = vadd.f32 %v2663_v33, %v1781_v35  ;;  %v2552_v48 = vpop.f32.mrb[52].mxu1  ;;  %v2664_v1 = vpop.f32.mrb[52].mxu0 }
 0x224   :  { %v2553_v12 = vpop.f32.mrb[53].mxu1  ;;  %v2665_v55 = vpop.f32.mrb[53].mxu0 }
 0x225   :  { %v2265_v37 = vmul.f32 %v2140_v17, %v2041_v52  ;;  %v2042_v45 = vmax.f32 %v1942_v31, 0.0  ;;  %v2554_v25 = vadd.f32 %v2553_v12, %v2552_v48  ;;  %v2555_v11 = vpop.f32.mrb[54].mxu1  ;;  %v2666_v57 = vadd.f32 %v2665_v55, %v2664_v1  ;;  %v2667_v10 = vpop.f32.mrb[54].mxu0 }
 0x226   :  { %v2556_v29 = vpop.f32.mrb[55].mxu1  ;;  %v2668_v7 = vpop.f32.mrb[55].mxu0 }
 0x227   :  { %v2296_v42 = vadd.f32 %v2295_v53, %v2265_v37  ;;  %v2266_v49 = vmul.f32 %v2145_v62, %v2042_v45  ;;  %v1786_v59 = vadd.f32 %v2554_v25, %v3932_v6  ;;  %v2557_v60 = vadd.f32 %v2556_v29, %v2555_v11  ;;  %v2175_v48 = vpop.permute.xlu1 %2174  ;;  %v2170_v1 = vpop.permute.xlu0 %2169 }
 0x228   :  { %v2669_v0 = vadd.f32 %v2668_v7, %v2667_v10 }
 0x229   :  { %v2297_v40 = vadd.f32 %v2296_v42, %v2266_v49  ;;  %v1789_v24 = vadd.f32 %v2557_v60, %v3930_v43  ;;  %v1947_v56 = vadd.f32 %v2666_v57, %v1786_v59 }
 0x22b   :  { %v2043_v17 = vmax.f32 %v1947_v56, 0.0  ;;  %v1950_v21 = vadd.f32 %v2669_v0, %v1789_v24  ;;  %v2558_v63 = vpop.f32.mrb[56].mxu1  ;;  %v2670_v2 = vpop.f32.mrb[56].mxu0 }
 0x22c   :  { %v2559_v47 = vpop.f32.mrb[57].mxu1  ;;  %v2671_v46 = vpop.f32.mrb[57].mxu0 }
 0x22d   :  { %v2267_v13 = vmul.f32 %v2150_v18, %v2043_v17  ;;  %v2044_v54 = vmax.f32 %v1950_v21, 0.0  ;;  %v2560_v9 = vadd.f32 %v2559_v47, %v2558_v63  ;;  %v2561_v62 = vpop.f32.mrb[58].mxu1  ;;  %v2672_v30 = vadd.f32 %v2671_v46, %v2670_v2  ;;  %v2673_v6 = vpop.f32.mrb[58].mxu0 }
 0x22e   :  { %v2562_v38 = vpop.f32.mrb[59].mxu1  ;;  %v2674_v3 = vpop.f32.mrb[59].mxu0 }
 0x22f   :  { %v2298_v34 = vadd.f32 %v2297_v40, %v2267_v13  ;;  %v2268_v33 = vmul.f32 %v2155_v15, %v2044_v54  ;;  %v1794_v43 = vadd.f32 %v2560_v9, %v3936_v20  ;;  %v2563_v53 = vadd.f32 %v2562_v38, %v2561_v62  ;;  %v2185_v17 = vpop.permute.xlu1 %2184  ;;  %v2180_v21 = vpop.permute.xlu0 %2179 }
 0x230   :  { %v2675_v35 = vadd.f32 %v2674_v3, %v2673_v6 }
 0x231   :  { %v2299_v23 = vadd.f32 %v2298_v34, %v2268_v33  ;;  %v1797_v52 = vadd.f32 %v2563_v53, %v3934_v36  ;;  %v1955_v31 = vadd.f32 %v2672_v30, %v1794_v43 }
 0x233   :  { %v2045_v18 = vmax.f32 %v1955_v31, 0.0  ;;  %v1958_v12 = vadd.f32 %v2675_v35, %v1797_v52  ;;  %v2564_v55 = vpop.f32.mrb[60].mxu1  ;;  %v2676_v37 = vpop.f32.mrb[60].mxu0 }
 0x234   :  { %v2565_v45 = vpop.f32.mrb[61].mxu1  ;;  %v2677_v25 = vpop.f32.mrb[61].mxu0 }
 0x235   :  { %v2269_v11 = vmul.f32 %v2160_v41, %v2045_v18  ;;  %v2046_v57 = vmax.f32 %v1958_v12, 0.0  ;;  %v2566_v10 = vadd.f32 %v2565_v45, %v2564_v55  ;;  %v2567_v15 = vpop.f32.mrb[62].mxu1  ;;  %v2678_v29 = vadd.f32 %v2677_v25, %v2676_v37  ;;  %v2679_v20 = vpop.f32.mrb[62].mxu0 }
 0x236   :  { %v2568_v7 = vpop.f32.mrb[63].mxu1  ;;  %v2680_v42 = vpop.f32.mrb[63].mxu0 }
 0x237   :  { %v2300_v49 = vadd.f32 %v2299_v23, %v2269_v11  ;;  %v2270_v59 = vmul.f32 %v2165_v32, %v2046_v57  ;;  %v1802_v36 = vadd.f32 %v2566_v10, %v3940_v26  ;;  %v2569_v60 = vadd.f32 %v2568_v7, %v2567_v15  ;;  %v2195_v52 = vpop.permute.xlu1 %2194  ;;  %v2190_v31 = vpop.permute.xlu0 %2189 }
 0x238   :  { %v2681_v0 = vadd.f32 %v2680_v42, %v2679_v20 }
 0x239   :  { %v2301_v40 = vadd.f32 %v2300_v49, %v2270_v59  ;;  %v1805_v24 = vadd.f32 %v2569_v60, %v3938_v50  ;;  %v1963_v56 = vadd.f32 %v2678_v29, %v1802_v36 }
 0x23b   :  { %v2047_v41 = vmax.f32 %v1963_v56, 0.0  ;;  %v1966_v63 = vadd.f32 %v2681_v0, %v1805_v24  ;;  %v2570_v2 = vpop.f32.mrb[64].mxu1  ;;  %v2682_v47 = vpop.f32.mrb[64].mxu0 }
 0x23c   :  { %v2571_v46 = vpop.f32.mrb[65].mxu1  ;;  %v2683_v13 = vpop.f32.mrb[65].mxu0 }
 0x23d   :  { %v2271_v54 = vmul.f32 %v2170_v1, %v2047_v41  ;;  %v2048_v9 = vmax.f32 %v1966_v63, 0.0  ;;  %v2572_v62 = vadd.f32 %v2571_v46, %v2570_v2  ;;  %v2573_v32 = vpop.f32.mrb[66].mxu1  ;;  %v2684_v30 = vadd.f32 %v2683_v13, %v2682_v47  ;;  %v2685_v26 = vpop.f32.mrb[66].mxu0 }
 0x23e   :  { %v2574_v6 = vpop.f32.mrb[67].mxu1  ;;  %v2686_v38 = vpop.f32.mrb[67].mxu0 }
 0x23f   :  { %v2302_v3 = vadd.f32 %v2301_v40, %v2271_v54  ;;  %v2272_v34 = vmul.f32 %v2175_v48, %v2048_v9  ;;  %v1810_v50 = vadd.f32 %v2572_v62, %v3944_v58  ;;  %v2575_v33 = vadd.f32 %v2574_v6, %v2573_v32  ;;  %v2205_v0 = vpop.permute.xlu1 %2204  ;;  %v2200_v40 = vpop.permute.xlu0 %2199 }
 0x240   :  { %v2687_v43 = vadd.f32 %v2686_v38, %v2685_v26 }
 0x241   :  { %v2303_v53 = vadd.f32 %v2302_v3, %v2272_v34  ;;  %v1813_v35 = vadd.f32 %v2575_v33, %v3942_v19  ;;  %v1971_v23 = vadd.f32 %v2684_v30, %v1810_v50 }
 0x243   :  { %v2049_v1 = vmax.f32 %v1971_v23, 0.0  ;;  %v1974_v18 = vadd.f32 %v2687_v43, %v1813_v35  ;;  %v2576_v12 = vpop.f32.mrb[68].mxu1  ;;  %v2688_v55 = vpop.f32.mrb[68].mxu0 }
 0x244   :  { %v2577_v37 = vpop.f32.mrb[69].mxu1  ;;  %v2689_v45 = vpop.f32.mrb[69].mxu0 }
 0x245   :  { %v2273_v25 = vmul.f32 %v2180_v21, %v2049_v1  ;;  %v2050_v11 = vmax.f32 %v1974_v18, 0.0  ;;  %v2578_v57 = vadd.f32 %v2577_v37, %v2576_v12  ;;  %v2579_v48 = vpop.f32.mrb[70].mxu1  ;;  %v2690_v10 = vadd.f32 %v2689_v45, %v2688_v55  ;;  %v2691_v58 = vpop.f32.mrb[70].mxu0 }
 0x246   :  { %v2580_v15 = vpop.f32.mrb[71].mxu1  ;;  %v2692_v29 = vpop.f32.mrb[71].mxu0 }
 0x247   :  { %v2304_v20 = vadd.f32 %v2303_v53, %v2273_v25  ;;  %v2274_v7 = vmul.f32 %v2185_v17, %v2050_v11  ;;  %v1818_v19 = vadd.f32 %v2578_v57, %v3948_v44  ;;  %v2581_v42 = vadd.f32 %v2580_v15, %v2579_v48  ;;  %v2215_v50 = vpop.permute.xlu1 %2214  ;;  %v2210_v33 = vpop.permute.xlu0 %2209 }
 0x248   :  { %v2693_v49 = vadd.f32 %v2692_v29, %v2691_v58 }
 0x249   :  { %v2305_v59 = vadd.f32 %v2304_v20, %v2274_v7  ;;  %v1821_v36 = vadd.f32 %v2581_v42, %v3946_v27  ;;  %v1979_v60 = vadd.f32 %v2690_v10, %v1818_v19 }
 0x24b   :  { %v2051_v24 = vmax.f32 %v1979_v60, 0.0  ;;  %v1982_v56 = vadd.f32 %v2693_v49, %v1821_v36  ;;  %v2582_v21 = vpop.f32.mrb[72].mxu1  ;;  %v2694_v41 = vpop.f32.mrb[72].mxu0 }
 0x24c   :  { %v2583_v63 = vpop.f32.mrb[73].mxu1  ;;  %v2695_v2 = vpop.f32.mrb[73].mxu0 }
 0x24d   :  { %v2275_v47 = vmul.f32 %v2190_v31, %v2051_v24  ;;  %v2052_v46 = vmax.f32 %v1982_v56, 0.0  ;;  %v2584_v13 = vadd.f32 %v2583_v63, %v2582_v21  ;;  %v2585_v17 = vpop.f32.mrb[74].mxu1  ;;  %v2696_v54 = vadd.f32 %v2695_v2, %v2694_v41  ;;  %v2697_v44 = vpop.f32.mrb[74].mxu0 }
 0x24e   :  { %v2586_v9 = vpop.f32.mrb[75].mxu1  ;;  %v2698_v62 = vpop.f32.mrb[75].mxu0 }
 0x24f   :  { %v2306_v32 = vadd.f32 %v2305_v59, %v2275_v47  ;;  %v2276_v30 = vmul.f32 %v2195_v52, %v2052_v46  ;;  %v1826_v27 = vadd.f32 %v2584_v13, %v3952_v5  ;;  %v2587_v26 = vadd.f32 %v2586_v9, %v2585_v17  ;;  %v2225_v20 = vpop.permute.xlu1 %2224  ;;  %v2220_v7 = vpop.permute.xlu0 %2219 }
 0x250   :  { %v2699_v6 = vadd.f32 %v2698_v62, %v2697_v44 }
 0x251   :  { %v2307_v38 = vadd.f32 %v2306_v32, %v2276_v30  ;;  %v1829_v3 = vadd.f32 %v2587_v26, %v3950_v61  ;;  %v1987_v34 = vadd.f32 %v2696_v54, %v1826_v27 }
 0x253   :  { %v2053_v43 = vmax.f32 %v1987_v34, 0.0  ;;  %v1990_v53 = vadd.f32 %v2699_v6, %v1829_v3  ;;  %v2588_v35 = vpop.f32.mrb[76].mxu1  ;;  %v2700_v23 = vpop.f32.mrb[76].mxu0 }
 0x254   :  { %v2589_v31 = vpop.f32.mrb[77].mxu1  ;;  %v2701_v1 = vpop.f32.mrb[77].mxu0 }
 0x255   :  { %v2277_v18 = vmul.f32 %v2200_v40, %v2053_v43  ;;  %v2054_v12 = vmax.f32 %v1990_v53, 0.0  ;;  %v2590_v55 = vadd.f32 %v2589_v31, %v2588_v35  ;;  %v2591_v52 = vpop.f32.mrb[78].mxu1  ;;  %v2702_v37 = vadd.f32 %v2701_v1, %v2700_v23  ;;  %v2703_v5 = vpop.f32.mrb[78].mxu0 }
 0x256   :  { %v2592_v45 = vpop.f32.mrb[79].mxu1  ;;  %v2704_v25 = vpop.f32.mrb[79].mxu0 }
 0x257   :  { %v2308_v11 = vadd.f32 %v2307_v38, %v2277_v18  ;;  %v2278_v57 = vmul.f32 %v2205_v0, %v2054_v12  ;;  %v1834_v61 = vadd.f32 %v2590_v55, %v3956_v16  ;;  %v2593_v48 = vadd.f32 %v2592_v45, %v2591_v52  ;;  %v3993_v9 = vpop.permute.xlu1 %1383  ;;  %v2230_v62 = vpop.permute.xlu0 %2229 }
 0x258   :  { %v2705_v10 = vadd.f32 %v2704_v25, %v2703_v5 }
 0x259   :  { %v2309_v58 = vadd.f32 %v2308_v11, %v2278_v57  ;;  %v1837_v15 = vadd.f32 %v2593_v48, %v3954_v51  ;;  %v1995_v29 = vadd.f32 %v2702_v37, %v1834_v61 }
 0x25b   :  { %v2055_v19 = vmax.f32 %v1995_v29, 0.0  ;;  %v1998_v42 = vadd.f32 %v2705_v10, %v1837_v15  ;;  %v2594_v49 = vpop.f32.mrb[80].mxu1  ;;  %v2706_v59 = vpop.f32.mrb[80].mxu0 }
 0x25c   :  { %v2595_v36 = vpop.f32.mrb[81].mxu1  ;;  %v2707_v60 = vpop.f32.mrb[81].mxu0 }
 0x25d   :  { %v2279_v40 = vmul.f32 %v2210_v33, %v2055_v19  ;;  %v2056_v24 = vmax.f32 %v1998_v42, 0.0  ;;  %v2596_v56 = vadd.f32 %v2595_v36, %v2594_v49  ;;  %v2597_v0 = vpop.f32.mrb[82].mxu1  ;;  %v2708_v21 = vadd.f32 %v2707_v60, %v2706_v59  ;;  %v2709_v16 = vpop.f32.mrb[82].mxu0 }
 0x25e   :  { %v2598_v41 = vpop.f32.mrb[83].mxu1  ;;  %v2710_v63 = vpop.f32.mrb[83].mxu0 }
 0x25f   :  { %v2310_v2 = vadd.f32 %v2309_v58, %v2279_v40  ;;  %v2280_v47 = vmul.f32 %v2215_v50, %v2056_v24  ;;  %v1842_v51 = vadd.f32 %v2596_v56, %v3960_v22  ;;  %v2599_v46 = vadd.f32 %v2598_v41, %v2597_v0  ;;  %v1389_v37 = vpop.permute.xlu1 %1388  ;;  %v2235_v5 = vpop.permute.xlu0 %2234 }
 0x260   :  { %v2711_v13 = vadd.f32 %v2710_v63, %v2709_v16 }
 0x261   :  { %v2311_v17 = vadd.f32 %v2310_v2, %v2280_v47  ;;  %v1845_v54 = vadd.f32 %v2599_v46, %v3958_v14  ;;  %v2003_v44 = vadd.f32 %v2708_v21, %v1842_v51 }
 0x263   :  { %v2057_v32 = vmax.f32 %v2003_v44, 0.0  ;;  %v2006_v30 = vadd.f32 %v2711_v13, %v1845_v54  ;;  %v2600_v27 = vpop.f32.mrb[84].mxu1  ;;  %v2712_v26 = vpop.f32.mrb[84].mxu0 }
 0x264   :  { %v2601_v6 = vpop.f32.mrb[85].mxu1  ;;  %v2713_v38 = vpop.f32.mrb[85].mxu0 }
 0x265   :  { %v2281_v3 = vmul.f32 %v2220_v7, %v2057_v32  ;;  %v2058_v34 = vmax.f32 %v2006_v30, 0.0  ;;  %v2602_v50 = vadd.f32 %v2601_v6, %v2600_v27  ;;  %v2603_v33 = vpop.f32.mrb[86].mxu1  ;;  %v2714_v22 = vadd.f32 %v2713_v38, %v2712_v26  ;;  %v2715_v43 = vpop.f32.mrb[86].mxu0 }
 0x266   :  { %v2604_v53 = vpop.f32.mrb[87].mxu1  ;;  %v2716_v35 = vpop.f32.mrb[87].mxu0 }
 0x267   :  { %v2312_v23 = vadd.f32 %v2311_v17, %v2281_v3  ;;  %v2282_v14 = vmul.f32 %v2225_v20, %v2058_v34  ;;  %v1850_v31 = vadd.f32 %v2602_v50, %v3964_v8  ;;  %v2605_v1 = vadd.f32 %v2604_v53, %v2603_v33  ;;  %v2245_v56 = vpop.permute.xlu1 %2244  ;;  %v2240_v0 = vpop.permute.xlu0 %2239 }
 0x268   :  { %v2717_v18 = vadd.f32 %v2716_v35, %v2715_v43 }
 0x269   :  { %v2313_v12 = vadd.f32 %v2312_v23, %v2282_v14  ;;  %v1853_v55 = vadd.f32 %v2605_v1, %v3962_v4  ;;  %v2011_v52 = vadd.f32 %v2714_v22, %v1850_v31  ;;  %v2332_v14 = vlaneseq }
 0x26b   :  { %v2059_v45 = vmax.f32 %v2011_v52, 0.0  ;;  %v2014_v25 = vadd.f32 %v2717_v18, %v1853_v55  ;;  %v2606_v11 = vpop.f32.mrb[88].mxu1  ;;  %v2718_v57 = vpop.f32.mrb[88].mxu0  ;;  %v2333_v18 = vshrl.u32 %v2332_v14, 7 }
 0x26c   :  { %v2607_v61 = vpop.f32.mrb[89].mxu1  ;;  %v2719_v48 = vpop.f32.mrb[89].mxu0 }
 0x26d   :  { %v2283_v10 = vmul.f32 %v2230_v62, %v2059_v45  ;;  %v2060_v58 = vmax.f32 %v2014_v25, 0.0  ;;  %v2608_v15 = vadd.f32 %v2607_v61, %v2606_v11  ;;  %v2609_v29 = vpop.f32.mrb[90].mxu1  ;;  %v2720_v20 = vadd.f32 %v2719_v48, %v2718_v57  ;;  %v2721_v8 = vpop.f32.mrb[90].mxu0 }
 0x26e   :  { %v2610_v7 = vpop.f32.mrb[91].mxu1  ;;  %v2722_v19 = vpop.f32.mrb[91].mxu0 }
 0x26f   :  { %v2314_v42 = vadd.f32 %v2313_v12, %v2283_v10  ;;  %v2284_v49 = vmul.f32 %v2235_v5, %v2060_v58  ;;  %v1858_v4 = vadd.f32 %v2608_v15, %v3968_v28  ;;  %v2611_v59 = vadd.f32 %v2610_v7, %v2609_v29  ;;  %v2250_v33 = vpop.permute.xlu0 %2249  ;;  %v2255_v53 = vpop.permute.xlu1 %2254 }
 0x270   :  { %v2723_v36 = vadd.f32 %v2722_v19, %v2721_v8 }
 0x271   :  { %v2315_v60 = vadd.f32 %v2314_v42, %v2284_v49  ;;  %v1861_v40 = vadd.f32 %v2611_v59, %v3966_v39  ;;  %v2019_v24 = vadd.f32 %v2720_v20, %v1858_v4 }
 0x273   :  { %v2061_v21 = vmax.f32 %v2019_v24, 0.0  ;;  %v2022_v16 = vadd.f32 %v2723_v36, %v1861_v40  ;;  %v2612_v41 = vpop.f32.mrb[92].mxu1  ;;  %v2724_v63 = vpop.f32.mrb[92].mxu0 }
 0x274   :  { %v2613_v2 = vpop.f32.mrb[93].mxu1  ;;  %v2725_v47 = vpop.f32.mrb[93].mxu0 }
 0x275   :  { %v2285_v51 = vmul.f32 %v2240_v0, %v2061_v21  ;;  %v2062_v46 = vmax.f32 %v2022_v16, 0.0  ;;  %v2614_v13 = vadd.f32 %v2613_v2, %v2612_v41  ;;  %v2615_v17 = vpop.f32.mrb[94].mxu1  ;;  %v2726_v54 = vadd.f32 %v2725_v47, %v2724_v63  ;;  %v2727_v28 = vpop.f32.mrb[94].mxu0 }
 0x276   :  { %v2616_v44 = vpop.f32.mrb[95].mxu1  ;;  %v2728_v62 = vpop.f32.mrb[95].mxu0 }
 0x277   :  { %v2316_v32 = vadd.f32 %v2315_v60, %v2285_v51  ;;  %v2286_v30 = vmul.f32 %v2245_v56, %v2062_v46  ;;  %v1866_v39 = vadd.f32 %v2614_v13, %v3993_v9  ;;  %v2617_v27 = vadd.f32 %v2616_v44, %v2615_v17  ;;  %v2330_v5 = vpop.permute.xlu0 %2329 }
 0x278   :  { %v2729_v26 = vadd.f32 %v2728_v62, %v2727_v28  ;;  %v2334_v9 = vsub.s32 0, %v2333_v18 }
 0x279   :  { %v2317_v6 = vadd.f32 %v2316_v32, %v2286_v30  ;;  %v1869_v38 = vadd.f32 %v2617_v27, %v1389_v37  ;;  %v2027_v3 = vadd.f32 %v2726_v54, %v1866_v39 }
 0x27a   :  { %v2335_v37 = vrot.slane %v2330_v5, %v2334_v9 }
 0x27b   :  { %v2063_v34 = vmax.f32 %v2027_v3, 0.0  ;;  %v2030_v50 = vadd.f32 %v2729_v26, %v1869_v38 }
 0x27d   :  { %v2287_v22 = vmul.f32 %v2250_v33, %v2063_v34  ;;  %v2064_v43 = vmax.f32 %v2030_v50, 0.0 }
 0x27f   :  { %v2318_v35 = vadd.f32 %v2317_v6, %v2287_v22  ;;  %v2288_v23 = vmul.f32 %v2255_v53, %v2064_v43 }
 0x281   :  { %v2319_v31 = vadd.f32 %v2318_v35, %v2288_v23 }
 0x283   :  { %v2320_v1 = vrot.slane %v2319_v31, 4 }
 0x285   :  { %v2321_v12 = vadd.f32 %v2320_v1, %v2319_v31 }
 0x287   :  { %v2322_v55 = vrot.slane %v2321_v12, 2 }
 0x289   :  { %v2323_v52 = vadd.f32 %v2322_v55, %v2321_v12 }
 0x28b   :  { %v2324_v45 = vrot.slane %v2323_v52, 1 }
 0x28d   :  { %v2325_v25 = vadd.f32 %v2324_v45, %v2323_v52 }
 0x28f   :  { %v2336_v11 = vadd.f32 %v2335_v37, %v2325_v25 }
 0x291   :  { %2337 = vst [vmem:[%s4010_s7] sm:$0x1] %v2336_v11 }

</bundles_post_ra>
